<compile_context>
chip_gen: v5e
topology: v5e:2x2
jax: 0.10.0
libtpu: 0.0.40
codegen_flags: <defaults>
</compile_context>

<pallas_src>
import math

import jax
import jax.numpy as jnp
from jax.experimental import pallas as pl
from jax.experimental.pallas import tpu as pltpu

# ---------------- problem sizes ----------------------------------------------
BATCH = 2
SEQ = 8
HID_DIM = 32
N_HEADS = 4
HEAD_DIM = HID_DIM // N_HEADS
PF_DIM = 64
SCALE = math.sqrt(float(HEAD_DIM))
LN_EPS = 1e-5
ROWS = BATCH * SEQ  # batch folded into the sublane (row) axis


# ---------------- in-kernel helpers ------------------------------------------
def _layer_norm(x, gamma, beta):
    """Row-wise LayerNorm over the last (lane) axis. x: (ROWS, D)."""
    mu = jnp.mean(x, axis=-1, keepdims=True)
    xc = x - mu
    var = jnp.mean(xc * xc, axis=-1, keepdims=True)
    inv = jax.lax.rsqrt(var + LN_EPS)          # EUP rsqrt
    return xc * inv * gamma + beta


def _mha(q, k, v):
    """Multi-head attention core. q/k/v: (BATCH*SEQ, HID_DIM) f32.

    The 1/sqrt(head_dim) scale is already folded into q (via Wq/bq in the
    wrapper).  Batch elements never mix: attention is computed per batch via
    static sublane slices.  The context is assembled entirely in vregs."""
    batch_ctx = []
    for b in range(BATCH):
        rows = slice(b * SEQ, (b + 1) * SEQ)
        qb = q[rows, :]                        # (S, D)  sublane slice
        kbt = k[rows, :].T                     # (D, S)  one transpose per batch
        vb = v[rows, :]                        # (S, D)
        head_ctx = []
        for h in range(N_HEADS):
            lo = h * HEAD_DIM
            hi = lo + HEAD_DIM
            # energy = (Q/s) @ K^T   (head slice of K^T is a sublane slice)
            e = jnp.dot(qb[:, lo:hi], kbt[lo:hi, :],
                        preferred_element_type=jnp.float32)       # (S, S)
            e = e - jnp.max(e, axis=-1, keepdims=True)
            p = jnp.exp(e)
            denom = jnp.sum(p, axis=-1, keepdims=True)
            p = p * pl.reciprocal(denom, approx=False)            # exact; EUP/VPU
            head_ctx.append(jnp.dot(p, vb[:, lo:hi],
                                    preferred_element_type=jnp.float32))
        batch_ctx.append(jnp.concatenate(head_ctx, axis=1))       # (S, D)
    return jnp.concatenate(batch_ctx, axis=0)                     # (ROWS, D)


# ---------------- fused decoder-layer kernel ----------------------------------
def decoder_layer_kernel(trg_ref, src_ref,
                         wqkv_sa_ref, bqkv_sa_ref, wo_sa_ref, bo_sa_ref,
                         wq_ea_ref, bq_ea_ref, wkv_ea_ref, bkv_ea_ref,
                         wo_ea_ref, bo_ea_ref,
                         w1_ref, b1_ref, w2_ref, b2_ref,
                         gamma_ref, beta_ref,
                         o_ref):
    D = HID_DIM
    x = trg_ref[...]                           # (ROWS, D)
    src = src_ref[...]                         # (ROWS, D)
    gamma = gamma_ref[...]                     # (1, D)
    beta = beta_ref[...]                       # (1, D)

    # ---- self attention (packed QKV projection: one MXU pass) ----
    qkv = jnp.dot(x, wqkv_sa_ref[...],
                  preferred_element_type=jnp.float32) + bqkv_sa_ref[...]   # (ROWS, 3D)
    ctx = _mha(qkv[:, 0:D], qkv[:, D:2 * D], qkv[:, 2 * D:3 * D])
    sa = jnp.dot(ctx, wo_sa_ref[...],
                 preferred_element_type=jnp.float32) + bo_sa_ref[...]
    x = _layer_norm(x + sa, gamma, beta)

    # ---- encoder attention (Q from trg; packed K|V projection from src) ----
    q = jnp.dot(x, wq_ea_ref[...],
                preferred_element_type=jnp.float32) + bq_ea_ref[...]       # scaled Q
    kv = jnp.dot(src, wkv_ea_ref[...],
                 preferred_element_type=jnp.float32) + bkv_ea_ref[...]     # (ROWS, 2D)
    ctx = _mha(q, kv[:, 0:D], kv[:, D:2 * D])
    ea = jnp.dot(ctx, wo_ea_ref[...],
                 preferred_element_type=jnp.float32) + bo_ea_ref[...]
    x = _layer_norm(x + ea, gamma, beta)

    # ---- positionwise feed-forward ----
    h = jnp.dot(x, w1_ref[...], preferred_element_type=jnp.float32) + b1_ref[...]
    h = jnp.maximum(h, 0.0)                    # ReLU
    ff = jnp.dot(h, w2_ref[...], preferred_element_type=jnp.float32) + b2_ref[...]
    x = _layer_norm(x + ff, gamma, beta)

    o_ref[...] = x.astype(o_ref.dtype)


# ---------------- wrapper ------------------------------------------------------
def decoder_layer(trg, src, params):
    """trg/src: (B, S, D) float32. params: PyTorch-style (out,in) weights."""
    B, S, D = trg.shape
    rows = B * S

    sa, ea, pf, ln = params["sa"], params["ea"], params["pf"], params["ln"]

    # Fold the 1/sqrt(head_dim) scale into the query projections; pack QKV / KV.
    wqkv_sa = jnp.concatenate([sa["wq"].T / SCALE, sa["wk"].T, sa["wv"].T], axis=1)  # (D, 3D)
    bqkv_sa = jnp.concatenate([sa["bq"] / SCALE, sa["bk"], sa["bv"]]).reshape(1, 3 * D)
    wo_sa = sa["wo"].T
    bo_sa = sa["bo"].reshape(1, D)

    wq_ea = ea["wq"].T / SCALE
    bq_ea = (ea["bq"] / SCALE).reshape(1, D)
    wkv_ea = jnp.concatenate([ea["wk"].T, ea["wv"].T], axis=1)                        # (D, 2D)
    bkv_ea = jnp.concatenate([ea["bk"], ea["bv"]]).reshape(1, 2 * D)
    wo_ea = ea["wo"].T
    bo_ea = ea["bo"].reshape(1, D)

    w1 = pf["w1"].T                      # (D, PF)
    b1 = pf["b1"].reshape(1, PF_DIM)
    w2 = pf["w2"].T                      # (PF, D)
    b2 = pf["b2"].reshape(1, D)

    gamma = ln["g"].reshape(1, D)
    beta = ln["b"].reshape(1, D)

    # Fold batch into rows: a single grid step over (B*S, D).
    trg2 = trg.reshape(rows, D)
    src2 = src.reshape(rows, D)

    args = (trg2, src2,
            wqkv_sa, bqkv_sa, wo_sa, bo_sa,
            wq_ea, bq_ea, wkv_ea, bkv_ea, wo_ea, bo_ea,
            w1, b1, w2, b2,
            gamma, beta)

    def full_spec(shape):
        # Whole array as one block (block_shape == array dims satisfies the
        # (8,128) rule); single grid step -> index map is all zeros.
        return pl.BlockSpec(shape, lambda i, _s=shape: tuple(0 for _ in _s))

    grid_spec = pltpu.PrefetchScalarGridSpec(
        num_scalar_prefetch=0,
        grid=(1,),                      # collapsed grid: no per-batch step overhead
        in_specs=[full_spec(a.shape) for a in args],
        out_specs=full_spec((rows, D)),
    )

    out = pl.pallas_call(
        decoder_layer_kernel,
        out_shape=jax.ShapeDtypeStruct((rows, D), trg.dtype),
        grid_spec=grid_spec,
        compiler_params=pltpu.CompilerParams(
            dimension_semantics=("arbitrary",)),
    )(*args)
    return out.reshape(B, S, D)


# ---------------- pure-JAX reference (mirrors the PyTorch forward) ------------
def _self_attention_ref(q, k, v, p):
    B, S, D = q.shape
    Q = q @ p["wq"].T + p["bq"]
    K = k @ p["wk"].T + p["bk"]
    V = v @ p["wv"].T + p["bv"]

    def split(x):
        return x.reshape(B, S, N_HEADS, HEAD_DIM).transpose(0, 2, 1, 3)

    Q, K, V = split(Q), split(K), split(V)
    energy = jnp.einsum("bhqd,bhkd->bhqk", Q, K) / SCALE
    attn = jax.nn.softmax(energy, axis=-1)
    x = jnp.einsum("bhqk,bhkd->bhqd", attn, V)
    x = x.transpose(0, 2, 1, 3).reshape(B, S, D)
    return x @ p["wo"].T + p["bo"]


def _layer_norm_ref(x, g, b):
    mu = jnp.mean(x, axis=-1, keepdims=True)
    var = jnp.mean((x - mu) ** 2, axis=-1, keepdims=True)
    return (x - mu) * jax.lax.rsqrt(var + LN_EPS) * g + b


def decoder_layer_ref(trg, src, params):
    g, b = params["ln"]["g"], params["ln"]["b"]
    x = _layer_norm_ref(trg + _self_attention_ref(trg, trg, trg, params["sa"]), g, b)
    x = _layer_norm_ref(x + _self_attention_ref(x, src, src, params["ea"]), g, b)
    pf = params["pf"]
    ff = jax.nn.relu(x @ pf["w1"].T + pf["b1"]) @ pf["w2"].T + pf["b2"]
    x = _layer_norm_ref(x + ff, g, b)
    return x


# ---------------- test ---------------------------------------------------------
if __name__ == "__main__":
    root = jax.random.PRNGKey(0)
    keys = iter(jax.random.split(root, 22))

    def nk():
        return next(keys)

    def linear(k, out_dim, in_dim, scale=0.1):
        kw, kb = jax.random.split(k)
        return (jax.random.normal(kw, (out_dim, in_dim), jnp.float32) * scale,
                jax.random.normal(kb, (out_dim,), jnp.float32) * scale)

    def attn_params():
        wq, bq = linear(nk(), HID_DIM, HID_DIM)
        wk, bk = linear(nk(), HID_DIM, HID_DIM)
        wv, bv = linear(nk(), HID_DIM, HID_DIM)
        wo, bo = linear(nk(), HID_DIM, HID_DIM)
        return dict(wq=wq, bq=bq, wk=wk, bk=bk, wv=wv, bv=bv, wo=wo, bo=bo)

    params = {"sa": attn_params(), "ea": attn_params()}
    w1, b1 = linear(nk(), PF_DIM, HID_DIM)
    w2, b2 = linear(nk(), HID_DIM, PF_DIM)
    params["pf"] = {"w1": w1, "b1": b1, "w2": w2, "b2": b2}
    params["ln"] = {
        "g": 1.0 + 0.1 * jax.random.normal(nk(), (HID_DIM,), jnp.float32),
        "b": 0.1 * jax.random.normal(nk(), (HID_DIM,), jnp.float32),
    }

    trg = jax.random.normal(nk(), (BATCH, SEQ, HID_DIM), jnp.float32)
    src = jax.random.normal(nk(), (BATCH, SEQ, HID_DIM), jnp.float32)

    out = decoder_layer(trg, src, params)
    out = jax.block_until_ready(out)

    ref = decoder_layer_ref(trg, src, params)
    assert out.shape == (BATCH, SEQ, HID_DIM)
    assert jnp.allclose(out, ref, rtol=5e-4, atol=5e-4), "mismatch vs reference"

    print("KERNEL_OK")
</pallas_src>

<mosaic_0001>
module attributes {stable_mosaic.version = 11 : i64} {
  func.func @decoder_layer_kernel(%arg0: i32, %arg1: memref<16x32xf32, #tpu.memory_space<vmem>>, %arg2: memref<16x32xf32, #tpu.memory_space<vmem>>, %arg3: memref<32x96xf32, #tpu.memory_space<vmem>>, %arg4: memref<1x96xf32, #tpu.memory_space<vmem>>, %arg5: memref<32x32xf32, #tpu.memory_space<vmem>>, %arg6: memref<1x32xf32, #tpu.memory_space<vmem>>, %arg7: memref<32x32xf32, #tpu.memory_space<vmem>>, %arg8: memref<1x32xf32, #tpu.memory_space<vmem>>, %arg9: memref<32x64xf32, #tpu.memory_space<vmem>>, %arg10: memref<1x64xf32, #tpu.memory_space<vmem>>, %arg11: memref<32x32xf32, #tpu.memory_space<vmem>>, %arg12: memref<1x32xf32, #tpu.memory_space<vmem>>, %arg13: memref<32x64xf32, #tpu.memory_space<vmem>>, %arg14: memref<1x64xf32, #tpu.memory_space<vmem>>, %arg15: memref<64x32xf32, #tpu.memory_space<vmem>>, %arg16: memref<1x32xf32, #tpu.memory_space<vmem>>, %arg17: memref<1x32xf32, #tpu.memory_space<vmem>>, %arg18: memref<1x32xf32, #tpu.memory_space<vmem>>, %arg19: memref<16x32xf32, #tpu.memory_space<vmem>>) attributes {dimension_semantics = [#tpu.dimension_semantics<arbitrary>], iteration_bounds = array<i64: 1>, scalar_prefetch = 0 : i64, scratch_operands = 0 : i64, tpu.core_type = #tpu.core_type<tc>, window_params = [{pipeline_mode = #tpu.pipeline_mode<synchronous>, transform_indices = @transform_0, window_bounds = array<i64: 16, 32>}, {pipeline_mode = #tpu.pipeline_mode<synchronous>, transform_indices = @transform_1, window_bounds = array<i64: 16, 32>}, {pipeline_mode = #tpu.pipeline_mode<synchronous>, transform_indices = @transform_2, window_bounds = array<i64: 32, 96>}, {pipeline_mode = #tpu.pipeline_mode<synchronous>, transform_indices = @transform_3, window_bounds = array<i64: 1, 96>}, {pipeline_mode = #tpu.pipeline_mode<synchronous>, transform_indices = @transform_4, window_bounds = array<i64: 32, 32>}, {pipeline_mode = #tpu.pipeline_mode<synchronous>, transform_indices = @transform_5, window_bounds = array<i64: 1, 32>}, {pipeline_mode = #tpu.pipeline_mode<synchronous>, transform_indices = @transform_6, window_bounds = array<i64: 32, 32>}, {pipeline_mode = #tpu.pipeline_mode<synchronous>, transform_indices = @transform_7, window_bounds = array<i64: 1, 32>}, {pipeline_mode = #tpu.pipeline_mode<synchronous>, transform_indices = @transform_8, window_bounds = array<i64: 32, 64>}, {pipeline_mode = #tpu.pipeline_mode<synchronous>, transform_indices = @transform_9, window_bounds = array<i64: 1, 64>}, {pipeline_mode = #tpu.pipeline_mode<synchronous>, transform_indices = @transform_10, window_bounds = array<i64: 32, 32>}, {pipeline_mode = #tpu.pipeline_mode<synchronous>, transform_indices = @transform_11, window_bounds = array<i64: 1, 32>}, {pipeline_mode = #tpu.pipeline_mode<synchronous>, transform_indices = @transform_12, window_bounds = array<i64: 32, 64>}, {pipeline_mode = #tpu.pipeline_mode<synchronous>, transform_indices = @transform_13, window_bounds = array<i64: 1, 64>}, {pipeline_mode = #tpu.pipeline_mode<synchronous>, transform_indices = @transform_14, window_bounds = array<i64: 64, 32>}, {pipeline_mode = #tpu.pipeline_mode<synchronous>, transform_indices = @transform_15, window_bounds = array<i64: 1, 32>}, {pipeline_mode = #tpu.pipeline_mode<synchronous>, transform_indices = @transform_16, window_bounds = array<i64: 1, 32>}, {pipeline_mode = #tpu.pipeline_mode<synchronous>, transform_indices = @transform_17, window_bounds = array<i64: 1, 32>}, {pipeline_mode = #tpu.pipeline_mode<synchronous>, transform_indices = @transform_18, window_bounds = array<i64: 16, 32>}]} {
    %c0 = arith.constant 0 : index
    %c0_0 = arith.constant 0 : index
    %0 = vector.load %arg1[%c0, %c0_0] : memref<16x32xf32, #tpu.memory_space<vmem>>, vector<16x32xf32>
    %c0_1 = arith.constant 0 : index
    %c0_2 = arith.constant 0 : index
    %1 = vector.load %arg2[%c0_1, %c0_2] : memref<16x32xf32, #tpu.memory_space<vmem>>, vector<16x32xf32>
    %c0_3 = arith.constant 0 : index
    %c0_4 = arith.constant 0 : index
    %2 = vector.load %arg17[%c0_3, %c0_4] : memref<1x32xf32, #tpu.memory_space<vmem>>, vector<1x32xf32>
    %c0_5 = arith.constant 0 : index
    %c0_6 = arith.constant 0 : index
    %3 = vector.load %arg18[%c0_5, %c0_6] : memref<1x32xf32, #tpu.memory_space<vmem>>, vector<1x32xf32>
    %c0_7 = arith.constant 0 : index
    %c0_8 = arith.constant 0 : index
    %4 = vector.load %arg3[%c0_7, %c0_8] : memref<32x96xf32, #tpu.memory_space<vmem>>, vector<32x96xf32>
    %cst = arith.constant dense<0.000000e+00> : vector<16x96xf32>
    %5 = tpu.matmul %0, %4, %cst {dimension_numbers = #tpu.dot_dimension_numbers<[1], [0], [0], [1], [0, 0, 1, 1], [], []>} : vector<16x32xf32>, vector<32x96xf32>, vector<16x96xf32> -> vector<16x96xf32>
    %c0_9 = arith.constant 0 : index
    %c0_10 = arith.constant 0 : index
    %6 = vector.load %arg4[%c0_9, %c0_10] : memref<1x96xf32, #tpu.memory_space<vmem>>, vector<1x96xf32>
    %7 = vector.broadcast %6 : vector<1x96xf32> to vector<16x96xf32>
    %8 = arith.addf %5, %7 : vector<16x96xf32>
    %9 = vector.extract_strided_slice %8 {offsets = [0, 0], sizes = [16, 32], strides = [1, 1]} : vector<16x96xf32> to vector<16x32xf32>
    %10 = vector.extract_strided_slice %8 {offsets = [0, 32], sizes = [16, 32], strides = [1, 1]} : vector<16x96xf32> to vector<16x32xf32>
    %11 = vector.extract_strided_slice %8 {offsets = [0, 64], sizes = [16, 32], strides = [1, 1]} : vector<16x96xf32> to vector<16x32xf32>
    %12 = vector.extract_strided_slice %9 {offsets = [0, 0], sizes = [8, 32], strides = [1, 1]} : vector<16x32xf32> to vector<8x32xf32>
    %13 = vector.extract_strided_slice %10 {offsets = [0, 0], sizes = [8, 32], strides = [1, 1]} : vector<16x32xf32> to vector<8x32xf32>
    %14 = tpu.transpose %13, [1, 0] : vector<8x32xf32> -> vector<32x8xf32>
    %15 = vector.extract_strided_slice %11 {offsets = [0, 0], sizes = [8, 32], strides = [1, 1]} : vector<16x32xf32> to vector<8x32xf32>
    %16 = vector.extract_strided_slice %12 {offsets = [0, 0], sizes = [8, 8], strides = [1, 1]} : vector<8x32xf32> to vector<8x8xf32>
    %17 = vector.extract_strided_slice %14 {offsets = [0, 0], sizes = [8, 8], strides = [1, 1]} : vector<32x8xf32> to vector<8x8xf32>
    %cst_11 = arith.constant dense<0.000000e+00> : vector<8x8xf32>
    %18 = tpu.matmul %16, %17, %cst_11 {dimension_numbers = #tpu.dot_dimension_numbers<[1], [0], [0], [1], [0, 0, 1, 1], [], []>} : vector<8x8xf32>, vector<8x8xf32>, vector<8x8xf32> -> vector<8x8xf32>
    %cst_12 = arith.constant dense<0xFF800000> : vector<8xf32>
    %19 = vector.multi_reduction <maximumf>, %18, %cst_12 [1] : vector<8x8xf32> to vector<8xf32>
    %20 = vector.shape_cast %19 : vector<8xf32> to vector<8x1xf32>
    %21 = vector.broadcast %20 : vector<8x1xf32> to vector<8x8xf32>
    %22 = arith.subf %18, %21 : vector<8x8xf32>
    %23 = math.exp %22 : vector<8x8xf32>
    %cst_13 = arith.constant dense<0.000000e+00> : vector<8xf32>
    %24 = vector.multi_reduction <add>, %23, %cst_13 [1] : vector<8x8xf32> to vector<8xf32>
    %25 = vector.shape_cast %24 : vector<8xf32> to vector<8x1xf32>
    %26 = tpu.reciprocal %25 : vector<8x1xf32> -> vector<8x1xf32>
    %27 = vector.broadcast %26 : vector<8x1xf32> to vector<8x8xf32>
    %28 = arith.mulf %23, %27 : vector<8x8xf32>
    %29 = vector.extract_strided_slice %15 {offsets = [0, 0], sizes = [8, 8], strides = [1, 1]} : vector<8x32xf32> to vector<8x8xf32>
    %cst_14 = arith.constant dense<0.000000e+00> : vector<8x8xf32>
    %30 = tpu.matmul %28, %29, %cst_14 {dimension_numbers = #tpu.dot_dimension_numbers<[1], [0], [0], [1], [0, 0, 1, 1], [], []>} : vector<8x8xf32>, vector<8x8xf32>, vector<8x8xf32> -> vector<8x8xf32>
    %31 = vector.extract_strided_slice %12 {offsets = [0, 8], sizes = [8, 8], strides = [1, 1]} : vector<8x32xf32> to vector<8x8xf32>
    %32 = vector.extract_strided_slice %14 {offsets = [8, 0], sizes = [8, 8], strides = [1, 1]} : vector<32x8xf32> to vector<8x8xf32>
    %cst_15 = arith.constant dense<0.000000e+00> : vector<8x8xf32>
    %33 = tpu.matmul %31, %32, %cst_15 {dimension_numbers = #tpu.dot_dimension_numbers<[1], [0], [0], [1], [0, 0, 1, 1], [], []>} : vector<8x8xf32>, vector<8x8xf32>, vector<8x8xf32> -> vector<8x8xf32>
    %cst_16 = arith.constant dense<0xFF800000> : vector<8xf32>
    %34 = vector.multi_reduction <maximumf>, %33, %cst_16 [1] : vector<8x8xf32> to vector<8xf32>
    %35 = vector.shape_cast %34 : vector<8xf32> to vector<8x1xf32>
    %36 = vector.broadcast %35 : vector<8x1xf32> to vector<8x8xf32>
    %37 = arith.subf %33, %36 : vector<8x8xf32>
    %38 = math.exp %37 : vector<8x8xf32>
    %cst_17 = arith.constant dense<0.000000e+00> : vector<8xf32>
    %39 = vector.multi_reduction <add>, %38, %cst_17 [1] : vector<8x8xf32> to vector<8xf32>
    %40 = vector.shape_cast %39 : vector<8xf32> to vector<8x1xf32>
    %41 = tpu.reciprocal %40 : vector<8x1xf32> -> vector<8x1xf32>
    %42 = vector.broadcast %41 : vector<8x1xf32> to vector<8x8xf32>
    %43 = arith.mulf %38, %42 : vector<8x8xf32>
    %44 = vector.extract_strided_slice %15 {offsets = [0, 8], sizes = [8, 8], strides = [1, 1]} : vector<8x32xf32> to vector<8x8xf32>
    %cst_18 = arith.constant dense<0.000000e+00> : vector<8x8xf32>
    %45 = tpu.matmul %43, %44, %cst_18 {dimension_numbers = #tpu.dot_dimension_numbers<[1], [0], [0], [1], [0, 0, 1, 1], [], []>} : vector<8x8xf32>, vector<8x8xf32>, vector<8x8xf32> -> vector<8x8xf32>
    %46 = vector.extract_strided_slice %12 {offsets = [0, 16], sizes = [8, 8], strides = [1, 1]} : vector<8x32xf32> to vector<8x8xf32>
    %47 = vector.extract_strided_slice %14 {offsets = [16, 0], sizes = [8, 8], strides = [1, 1]} : vector<32x8xf32> to vector<8x8xf32>
    %cst_19 = arith.constant dense<0.000000e+00> : vector<8x8xf32>
    %48 = tpu.matmul %46, %47, %cst_19 {dimension_numbers = #tpu.dot_dimension_numbers<[1], [0], [0], [1], [0, 0, 1, 1], [], []>} : vector<8x8xf32>, vector<8x8xf32>, vector<8x8xf32> -> vector<8x8xf32>
    %cst_20 = arith.constant dense<0xFF800000> : vector<8xf32>
    %49 = vector.multi_reduction <maximumf>, %48, %cst_20 [1] : vector<8x8xf32> to vector<8xf32>
    %50 = vector.shape_cast %49 : vector<8xf32> to vector<8x1xf32>
    %51 = vector.broadcast %50 : vector<8x1xf32> to vector<8x8xf32>
    %52 = arith.subf %48, %51 : vector<8x8xf32>
    %53 = math.exp %52 : vector<8x8xf32>
    %cst_21 = arith.constant dense<0.000000e+00> : vector<8xf32>
    %54 = vector.multi_reduction <add>, %53, %cst_21 [1] : vector<8x8xf32> to vector<8xf32>
    %55 = vector.shape_cast %54 : vector<8xf32> to vector<8x1xf32>
    %56 = tpu.reciprocal %55 : vector<8x1xf32> -> vector<8x1xf32>
    %57 = vector.broadcast %56 : vector<8x1xf32> to vector<8x8xf32>
    %58 = arith.mulf %53, %57 : vector<8x8xf32>
    %59 = vector.extract_strided_slice %15 {offsets = [0, 16], sizes = [8, 8], strides = [1, 1]} : vector<8x32xf32> to vector<8x8xf32>
    %cst_22 = arith.constant dense<0.000000e+00> : vector<8x8xf32>
    %60 = tpu.matmul %58, %59, %cst_22 {dimension_numbers = #tpu.dot_dimension_numbers<[1], [0], [0], [1], [0, 0, 1, 1], [], []>} : vector<8x8xf32>, vector<8x8xf32>, vector<8x8xf32> -> vector<8x8xf32>
    %61 = vector.extract_strided_slice %12 {offsets = [0, 24], sizes = [8, 8], strides = [1, 1]} : vector<8x32xf32> to vector<8x8xf32>
    %62 = vector.extract_strided_slice %14 {offsets = [24, 0], sizes = [8, 8], strides = [1, 1]} : vector<32x8xf32> to vector<8x8xf32>
    %cst_23 = arith.constant dense<0.000000e+00> : vector<8x8xf32>
    %63 = tpu.matmul %61, %62, %cst_23 {dimension_numbers = #tpu.dot_dimension_numbers<[1], [0], [0], [1], [0, 0, 1, 1], [], []>} : vector<8x8xf32>, vector<8x8xf32>, vector<8x8xf32> -> vector<8x8xf32>
    %cst_24 = arith.constant dense<0xFF800000> : vector<8xf32>
    %64 = vector.multi_reduction <maximumf>, %63, %cst_24 [1] : vector<8x8xf32> to vector<8xf32>
    %65 = vector.shape_cast %64 : vector<8xf32> to vector<8x1xf32>
    %66 = vector.broadcast %65 : vector<8x1xf32> to vector<8x8xf32>
    %67 = arith.subf %63, %66 : vector<8x8xf32>
    %68 = math.exp %67 : vector<8x8xf32>
    %cst_25 = arith.constant dense<0.000000e+00> : vector<8xf32>
    %69 = vector.multi_reduction <add>, %68, %cst_25 [1] : vector<8x8xf32> to vector<8xf32>
    %70 = vector.shape_cast %69 : vector<8xf32> to vector<8x1xf32>
    %71 = tpu.reciprocal %70 : vector<8x1xf32> -> vector<8x1xf32>
    %72 = vector.broadcast %71 : vector<8x1xf32> to vector<8x8xf32>
    %73 = arith.mulf %68, %72 : vector<8x8xf32>
    %74 = vector.extract_strided_slice %15 {offsets = [0, 24], sizes = [8, 8], strides = [1, 1]} : vector<8x32xf32> to vector<8x8xf32>
    %cst_26 = arith.constant dense<0.000000e+00> : vector<8x8xf32>
    %75 = tpu.matmul %73, %74, %cst_26 {dimension_numbers = #tpu.dot_dimension_numbers<[1], [0], [0], [1], [0, 0, 1, 1], [], []>} : vector<8x8xf32>, vector<8x8xf32>, vector<8x8xf32> -> vector<8x8xf32>
    %76 = tpu.concatenate %30, %45, %60, %75 in 1 : vector<8x8xf32>, vector<8x8xf32>, vector<8x8xf32>, vector<8x8xf32> -> vector<8x32xf32>
    %77 = vector.extract_strided_slice %9 {offsets = [8, 0], sizes = [8, 32], strides = [1, 1]} : vector<16x32xf32> to vector<8x32xf32>
    %78 = vector.extract_strided_slice %10 {offsets = [8, 0], sizes = [8, 32], strides = [1, 1]} : vector<16x32xf32> to vector<8x32xf32>
    %79 = tpu.transpose %78, [1, 0] : vector<8x32xf32> -> vector<32x8xf32>
    %80 = vector.extract_strided_slice %11 {offsets = [8, 0], sizes = [8, 32], strides = [1, 1]} : vector<16x32xf32> to vector<8x32xf32>
    %81 = vector.extract_strided_slice %77 {offsets = [0, 0], sizes = [8, 8], strides = [1, 1]} : vector<8x32xf32> to vector<8x8xf32>
    %82 = vector.extract_strided_slice %79 {offsets = [0, 0], sizes = [8, 8], strides = [1, 1]} : vector<32x8xf32> to vector<8x8xf32>
    %cst_27 = arith.constant dense<0.000000e+00> : vector<8x8xf32>
    %83 = tpu.matmul %81, %82, %cst_27 {dimension_numbers = #tpu.dot_dimension_numbers<[1], [0], [0], [1], [0, 0, 1, 1], [], []>} : vector<8x8xf32>, vector<8x8xf32>, vector<8x8xf32> -> vector<8x8xf32>
    %cst_28 = arith.constant dense<0xFF800000> : vector<8xf32>
    %84 = vector.multi_reduction <maximumf>, %83, %cst_28 [1] : vector<8x8xf32> to vector<8xf32>
    %85 = vector.shape_cast %84 : vector<8xf32> to vector<8x1xf32>
    %86 = vector.broadcast %85 : vector<8x1xf32> to vector<8x8xf32>
    %87 = arith.subf %83, %86 : vector<8x8xf32>
    %88 = math.exp %87 : vector<8x8xf32>
    %cst_29 = arith.constant dense<0.000000e+00> : vector<8xf32>
    %89 = vector.multi_reduction <add>, %88, %cst_29 [1] : vector<8x8xf32> to vector<8xf32>
    %90 = vector.shape_cast %89 : vector<8xf32> to vector<8x1xf32>
    %91 = tpu.reciprocal %90 : vector<8x1xf32> -> vector<8x1xf32>
    %92 = vector.broadcast %91 : vector<8x1xf32> to vector<8x8xf32>
    %93 = arith.mulf %88, %92 : vector<8x8xf32>
    %94 = vector.extract_strided_slice %80 {offsets = [0, 0], sizes = [8, 8], strides = [1, 1]} : vector<8x32xf32> to vector<8x8xf32>
    %cst_30 = arith.constant dense<0.000000e+00> : vector<8x8xf32>
    %95 = tpu.matmul %93, %94, %cst_30 {dimension_numbers = #tpu.dot_dimension_numbers<[1], [0], [0], [1], [0, 0, 1, 1], [], []>} : vector<8x8xf32>, vector<8x8xf32>, vector<8x8xf32> -> vector<8x8xf32>
    %96 = vector.extract_strided_slice %77 {offsets = [0, 8], sizes = [8, 8], strides = [1, 1]} : vector<8x32xf32> to vector<8x8xf32>
    %97 = vector.extract_strided_slice %79 {offsets = [8, 0], sizes = [8, 8], strides = [1, 1]} : vector<32x8xf32> to vector<8x8xf32>
    %cst_31 = arith.constant dense<0.000000e+00> : vector<8x8xf32>
    %98 = tpu.matmul %96, %97, %cst_31 {dimension_numbers = #tpu.dot_dimension_numbers<[1], [0], [0], [1], [0, 0, 1, 1], [], []>} : vector<8x8xf32>, vector<8x8xf32>, vector<8x8xf32> -> vector<8x8xf32>
    %cst_32 = arith.constant dense<0xFF800000> : vector<8xf32>
    %99 = vector.multi_reduction <maximumf>, %98, %cst_32 [1] : vector<8x8xf32> to vector<8xf32>
    %100 = vector.shape_cast %99 : vector<8xf32> to vector<8x1xf32>
    %101 = vector.broadcast %100 : vector<8x1xf32> to vector<8x8xf32>
    %102 = arith.subf %98, %101 : vector<8x8xf32>
    %103 = math.exp %102 : vector<8x8xf32>
    %cst_33 = arith.constant dense<0.000000e+00> : vector<8xf32>
    %104 = vector.multi_reduction <add>, %103, %cst_33 [1] : vector<8x8xf32> to vector<8xf32>
    %105 = vector.shape_cast %104 : vector<8xf32> to vector<8x1xf32>
    %106 = tpu.reciprocal %105 : vector<8x1xf32> -> vector<8x1xf32>
    %107 = vector.broadcast %106 : vector<8x1xf32> to vector<8x8xf32>
    %108 = arith.mulf %103, %107 : vector<8x8xf32>
    %109 = vector.extract_strided_slice %80 {offsets = [0, 8], sizes = [8, 8], strides = [1, 1]} : vector<8x32xf32> to vector<8x8xf32>
    %cst_34 = arith.constant dense<0.000000e+00> : vector<8x8xf32>
    %110 = tpu.matmul %108, %109, %cst_34 {dimension_numbers = #tpu.dot_dimension_numbers<[1], [0], [0], [1], [0, 0, 1, 1], [], []>} : vector<8x8xf32>, vector<8x8xf32>, vector<8x8xf32> -> vector<8x8xf32>
    %111 = vector.extract_strided_slice %77 {offsets = [0, 16], sizes = [8, 8], strides = [1, 1]} : vector<8x32xf32> to vector<8x8xf32>
    %112 = vector.extract_strided_slice %79 {offsets = [16, 0], sizes = [8, 8], strides = [1, 1]} : vector<32x8xf32> to vector<8x8xf32>
    %cst_35 = arith.constant dense<0.000000e+00> : vector<8x8xf32>
    %113 = tpu.matmul %111, %112, %cst_35 {dimension_numbers = #tpu.dot_dimension_numbers<[1], [0], [0], [1], [0, 0, 1, 1], [], []>} : vector<8x8xf32>, vector<8x8xf32>, vector<8x8xf32> -> vector<8x8xf32>
    %cst_36 = arith.constant dense<0xFF800000> : vector<8xf32>
    %114 = vector.multi_reduction <maximumf>, %113, %cst_36 [1] : vector<8x8xf32> to vector<8xf32>
    %115 = vector.shape_cast %114 : vector<8xf32> to vector<8x1xf32>
    %116 = vector.broadcast %115 : vector<8x1xf32> to vector<8x8xf32>
    %117 = arith.subf %113, %116 : vector<8x8xf32>
    %118 = math.exp %117 : vector<8x8xf32>
    %cst_37 = arith.constant dense<0.000000e+00> : vector<8xf32>
    %119 = vector.multi_reduction <add>, %118, %cst_37 [1] : vector<8x8xf32> to vector<8xf32>
    %120 = vector.shape_cast %119 : vector<8xf32> to vector<8x1xf32>
    %121 = tpu.reciprocal %120 : vector<8x1xf32> -> vector<8x1xf32>
    %122 = vector.broadcast %121 : vector<8x1xf32> to vector<8x8xf32>
    %123 = arith.mulf %118, %122 : vector<8x8xf32>
    %124 = vector.extract_strided_slice %80 {offsets = [0, 16], sizes = [8, 8], strides = [1, 1]} : vector<8x32xf32> to vector<8x8xf32>
    %cst_38 = arith.constant dense<0.000000e+00> : vector<8x8xf32>
    %125 = tpu.matmul %123, %124, %cst_38 {dimension_numbers = #tpu.dot_dimension_numbers<[1], [0], [0], [1], [0, 0, 1, 1], [], []>} : vector<8x8xf32>, vector<8x8xf32>, vector<8x8xf32> -> vector<8x8xf32>
    %126 = vector.extract_strided_slice %77 {offsets = [0, 24], sizes = [8, 8], strides = [1, 1]} : vector<8x32xf32> to vector<8x8xf32>
    %127 = vector.extract_strided_slice %79 {offsets = [24, 0], sizes = [8, 8], strides = [1, 1]} : vector<32x8xf32> to vector<8x8xf32>
    %cst_39 = arith.constant dense<0.000000e+00> : vector<8x8xf32>
    %128 = tpu.matmul %126, %127, %cst_39 {dimension_numbers = #tpu.dot_dimension_numbers<[1], [0], [0], [1], [0, 0, 1, 1], [], []>} : vector<8x8xf32>, vector<8x8xf32>, vector<8x8xf32> -> vector<8x8xf32>
    %cst_40 = arith.constant dense<0xFF800000> : vector<8xf32>
    %129 = vector.multi_reduction <maximumf>, %128, %cst_40 [1] : vector<8x8xf32> to vector<8xf32>
    %130 = vector.shape_cast %129 : vector<8xf32> to vector<8x1xf32>
    %131 = vector.broadcast %130 : vector<8x1xf32> to vector<8x8xf32>
    %132 = arith.subf %128, %131 : vector<8x8xf32>
    %133 = math.exp %132 : vector<8x8xf32>
    %cst_41 = arith.constant dense<0.000000e+00> : vector<8xf32>
    %134 = vector.multi_reduction <add>, %133, %cst_41 [1] : vector<8x8xf32> to vector<8xf32>
    %135 = vector.shape_cast %134 : vector<8xf32> to vector<8x1xf32>
    %136 = tpu.reciprocal %135 : vector<8x1xf32> -> vector<8x1xf32>
    %137 = vector.broadcast %136 : vector<8x1xf32> to vector<8x8xf32>
    %138 = arith.mulf %133, %137 : vector<8x8xf32>
    %139 = vector.extract_strided_slice %80 {offsets = [0, 24], sizes = [8, 8], strides = [1, 1]} : vector<8x32xf32> to vector<8x8xf32>
    %cst_42 = arith.constant dense<0.000000e+00> : vector<8x8xf32>
    %140 = tpu.matmul %138, %139, %cst_42 {dimension_numbers = #tpu.dot_dimension_numbers<[1], [0], [0], [1], [0, 0, 1, 1], [], []>} : vector<8x8xf32>, vector<8x8xf32>, vector<8x8xf32> -> vector<8x8xf32>
    %141 = tpu.concatenate %95, %110, %125, %140 in 1 : vector<8x8xf32>, vector<8x8xf32>, vector<8x8xf32>, vector<8x8xf32> -> vector<8x32xf32>
    %142 = tpu.concatenate %76, %141 in 0 : vector<8x32xf32>, vector<8x32xf32> -> vector<16x32xf32>
    %c0_43 = arith.constant 0 : index
    %c0_44 = arith.constant 0 : index
    %143 = vector.load %arg5[%c0_43, %c0_44] : memref<32x32xf32, #tpu.memory_space<vmem>>, vector<32x32xf32>
    %cst_45 = arith.constant dense<0.000000e+00> : vector<16x32xf32>
    %144 = tpu.matmul %142, %143, %cst_45 {dimension_numbers = #tpu.dot_dimension_numbers<[1], [0], [0], [1], [0, 0, 1, 1], [], []>} : vector<16x32xf32>, vector<32x32xf32>, vector<16x32xf32> -> vector<16x32xf32>
    %c0_46 = arith.constant 0 : index
    %c0_47 = arith.constant 0 : index
    %145 = vector.load %arg6[%c0_46, %c0_47] : memref<1x32xf32, #tpu.memory_space<vmem>>, vector<1x32xf32>
    %146 = vector.broadcast %145 : vector<1x32xf32> to vector<16x32xf32>
    %147 = arith.addf %144, %146 : vector<16x32xf32>
    %148 = arith.addf %0, %147 : vector<16x32xf32>
    %cst_48 = arith.constant dense<0.000000e+00> : vector<16xf32>
    %149 = vector.multi_reduction <add>, %148, %cst_48 [1] : vector<16x32xf32> to vector<16xf32>
    %150 = vector.shape_cast %149 : vector<16xf32> to vector<16x1xf32>
    %cst_49 = arith.constant 3.200000e+01 : f32
    %151 = vector.broadcast %cst_49 : f32 to vector<16x1xf32>
    %152 = arith.divf %150, %151 : vector<16x1xf32>
    %153 = vector.broadcast %152 : vector<16x1xf32> to vector<16x32xf32>
    %154 = arith.subf %148, %153 : vector<16x32xf32>
    %155 = arith.mulf %154, %154 : vector<16x32xf32>
    %cst_50 = arith.constant dense<0.000000e+00> : vector<16xf32>
    %156 = vector.multi_reduction <add>, %155, %cst_50 [1] : vector<16x32xf32> to vector<16xf32>
    %157 = vector.shape_cast %156 : vector<16xf32> to vector<16x1xf32>
    %cst_51 = arith.constant 3.200000e+01 : f32
    %158 = vector.broadcast %cst_51 : f32 to vector<16x1xf32>
    %159 = arith.divf %157, %158 : vector<16x1xf32>
    %cst_52 = arith.constant 9.99999974E-6 : f32
    %160 = vector.broadcast %cst_52 : f32 to vector<16x1xf32>
    %161 = arith.addf %159, %160 : vector<16x1xf32>
    %162 = math.rsqrt %161 : vector<16x1xf32>
    %163 = vector.broadcast %162 : vector<16x1xf32> to vector<16x32xf32>
    %164 = arith.mulf %154, %163 : vector<16x32xf32>
    %165 = vector.broadcast %2 : vector<1x32xf32> to vector<16x32xf32>
    %166 = arith.mulf %164, %165 : vector<16x32xf32>
    %167 = vector.broadcast %3 : vector<1x32xf32> to vector<16x32xf32>
    %168 = arith.addf %166, %167 : vector<16x32xf32>
    %c0_53 = arith.constant 0 : index
    %c0_54 = arith.constant 0 : index
    %169 = vector.load %arg7[%c0_53, %c0_54] : memref<32x32xf32, #tpu.memory_space<vmem>>, vector<32x32xf32>
    %cst_55 = arith.constant dense<0.000000e+00> : vector<16x32xf32>
    %170 = tpu.matmul %168, %169, %cst_55 {dimension_numbers = #tpu.dot_dimension_numbers<[1], [0], [0], [1], [0, 0, 1, 1], [], []>} : vector<16x32xf32>, vector<32x32xf32>, vector<16x32xf32> -> vector<16x32xf32>
    %c0_56 = arith.constant 0 : index
    %c0_57 = arith.constant 0 : index
    %171 = vector.load %arg8[%c0_56, %c0_57] : memref<1x32xf32, #tpu.memory_space<vmem>>, vector<1x32xf32>
    %172 = vector.broadcast %171 : vector<1x32xf32> to vector<16x32xf32>
    %173 = arith.addf %170, %172 : vector<16x32xf32>
    %c0_58 = arith.constant 0 : index
    %c0_59 = arith.constant 0 : index
    %174 = vector.load %arg9[%c0_58, %c0_59] : memref<32x64xf32, #tpu.memory_space<vmem>>, vector<32x64xf32>
    %cst_60 = arith.constant dense<0.000000e+00> : vector<16x64xf32>
    %175 = tpu.matmul %1, %174, %cst_60 {dimension_numbers = #tpu.dot_dimension_numbers<[1], [0], [0], [1], [0, 0, 1, 1], [], []>} : vector<16x32xf32>, vector<32x64xf32>, vector<16x64xf32> -> vector<16x64xf32>
    %c0_61 = arith.constant 0 : index
    %c0_62 = arith.constant 0 : index
    %176 = vector.load %arg10[%c0_61, %c0_62] : memref<1x64xf32, #tpu.memory_space<vmem>>, vector<1x64xf32>
    %177 = vector.broadcast %176 : vector<1x64xf32> to vector<16x64xf32>
    %178 = arith.addf %175, %177 : vector<16x64xf32>
    %179 = vector.extract_strided_slice %178 {offsets = [0, 0], sizes = [16, 32], strides = [1, 1]} : vector<16x64xf32> to vector<16x32xf32>
    %180 = vector.extract_strided_slice %178 {offsets = [0, 32], sizes = [16, 32], strides = [1, 1]} : vector<16x64xf32> to vector<16x32xf32>
    %181 = vector.extract_strided_slice %173 {offsets = [0, 0], sizes = [8, 32], strides = [1, 1]} : vector<16x32xf32> to vector<8x32xf32>
    %182 = vector.extract_strided_slice %179 {offsets = [0, 0], sizes = [8, 32], strides = [1, 1]} : vector<16x32xf32> to vector<8x32xf32>
    %183 = tpu.transpose %182, [1, 0] : vector<8x32xf32> -> vector<32x8xf32>
    %184 = vector.extract_strided_slice %180 {offsets = [0, 0], sizes = [8, 32], strides = [1, 1]} : vector<16x32xf32> to vector<8x32xf32>
    %185 = vector.extract_strided_slice %181 {offsets = [0, 0], sizes = [8, 8], strides = [1, 1]} : vector<8x32xf32> to vector<8x8xf32>
    %186 = vector.extract_strided_slice %183 {offsets = [0, 0], sizes = [8, 8], strides = [1, 1]} : vector<32x8xf32> to vector<8x8xf32>
    %cst_63 = arith.constant dense<0.000000e+00> : vector<8x8xf32>
    %187 = tpu.matmul %185, %186, %cst_63 {dimension_numbers = #tpu.dot_dimension_numbers<[1], [0], [0], [1], [0, 0, 1, 1], [], []>} : vector<8x8xf32>, vector<8x8xf32>, vector<8x8xf32> -> vector<8x8xf32>
    %cst_64 = arith.constant dense<0xFF800000> : vector<8xf32>
    %188 = vector.multi_reduction <maximumf>, %187, %cst_64 [1] : vector<8x8xf32> to vector<8xf32>
    %189 = vector.shape_cast %188 : vector<8xf32> to vector<8x1xf32>
    %190 = vector.broadcast %189 : vector<8x1xf32> to vector<8x8xf32>
    %191 = arith.subf %187, %190 : vector<8x8xf32>
    %192 = math.exp %191 : vector<8x8xf32>
    %cst_65 = arith.constant dense<0.000000e+00> : vector<8xf32>
    %193 = vector.multi_reduction <add>, %192, %cst_65 [1] : vector<8x8xf32> to vector<8xf32>
    %194 = vector.shape_cast %193 : vector<8xf32> to vector<8x1xf32>
    %195 = tpu.reciprocal %194 : vector<8x1xf32> -> vector<8x1xf32>
    %196 = vector.broadcast %195 : vector<8x1xf32> to vector<8x8xf32>
    %197 = arith.mulf %192, %196 : vector<8x8xf32>
    %198 = vector.extract_strided_slice %184 {offsets = [0, 0], sizes = [8, 8], strides = [1, 1]} : vector<8x32xf32> to vector<8x8xf32>
    %cst_66 = arith.constant dense<0.000000e+00> : vector<8x8xf32>
    %199 = tpu.matmul %197, %198, %cst_66 {dimension_numbers = #tpu.dot_dimension_numbers<[1], [0], [0], [1], [0, 0, 1, 1], [], []>} : vector<8x8xf32>, vector<8x8xf32>, vector<8x8xf32> -> vector<8x8xf32>
    %200 = vector.extract_strided_slice %181 {offsets = [0, 8], sizes = [8, 8], strides = [1, 1]} : vector<8x32xf32> to vector<8x8xf32>
    %201 = vector.extract_strided_slice %183 {offsets = [8, 0], sizes = [8, 8], strides = [1, 1]} : vector<32x8xf32> to vector<8x8xf32>
    %cst_67 = arith.constant dense<0.000000e+00> : vector<8x8xf32>
    %202 = tpu.matmul %200, %201, %cst_67 {dimension_numbers = #tpu.dot_dimension_numbers<[1], [0], [0], [1], [0, 0, 1, 1], [], []>} : vector<8x8xf32>, vector<8x8xf32>, vector<8x8xf32> -> vector<8x8xf32>
    %cst_68 = arith.constant dense<0xFF800000> : vector<8xf32>
    %203 = vector.multi_reduction <maximumf>, %202, %cst_68 [1] : vector<8x8xf32> to vector<8xf32>
    %204 = vector.shape_cast %203 : vector<8xf32> to vector<8x1xf32>
    %205 = vector.broadcast %204 : vector<8x1xf32> to vector<8x8xf32>
    %206 = arith.subf %202, %205 : vector<8x8xf32>
    %207 = math.exp %206 : vector<8x8xf32>
    %cst_69 = arith.constant dense<0.000000e+00> : vector<8xf32>
    %208 = vector.multi_reduction <add>, %207, %cst_69 [1] : vector<8x8xf32> to vector<8xf32>
    %209 = vector.shape_cast %208 : vector<8xf32> to vector<8x1xf32>
    %210 = tpu.reciprocal %209 : vector<8x1xf32> -> vector<8x1xf32>
    %211 = vector.broadcast %210 : vector<8x1xf32> to vector<8x8xf32>
    %212 = arith.mulf %207, %211 : vector<8x8xf32>
    %213 = vector.extract_strided_slice %184 {offsets = [0, 8], sizes = [8, 8], strides = [1, 1]} : vector<8x32xf32> to vector<8x8xf32>
    %cst_70 = arith.constant dense<0.000000e+00> : vector<8x8xf32>
    %214 = tpu.matmul %212, %213, %cst_70 {dimension_numbers = #tpu.dot_dimension_numbers<[1], [0], [0], [1], [0, 0, 1, 1], [], []>} : vector<8x8xf32>, vector<8x8xf32>, vector<8x8xf32> -> vector<8x8xf32>
    %215 = vector.extract_strided_slice %181 {offsets = [0, 16], sizes = [8, 8], strides = [1, 1]} : vector<8x32xf32> to vector<8x8xf32>
    %216 = vector.extract_strided_slice %183 {offsets = [16, 0], sizes = [8, 8], strides = [1, 1]} : vector<32x8xf32> to vector<8x8xf32>
    %cst_71 = arith.constant dense<0.000000e+00> : vector<8x8xf32>
    %217 = tpu.matmul %215, %216, %cst_71 {dimension_numbers = #tpu.dot_dimension_numbers<[1], [0], [0], [1], [0, 0, 1, 1], [], []>} : vector<8x8xf32>, vector<8x8xf32>, vector<8x8xf32> -> vector<8x8xf32>
    %cst_72 = arith.constant dense<0xFF800000> : vector<8xf32>
    %218 = vector.multi_reduction <maximumf>, %217, %cst_72 [1] : vector<8x8xf32> to vector<8xf32>
    %219 = vector.shape_cast %218 : vector<8xf32> to vector<8x1xf32>
    %220 = vector.broadcast %219 : vector<8x1xf32> to vector<8x8xf32>
    %221 = arith.subf %217, %220 : vector<8x8xf32>
    %222 = math.exp %221 : vector<8x8xf32>
    %cst_73 = arith.constant dense<0.000000e+00> : vector<8xf32>
    %223 = vector.multi_reduction <add>, %222, %cst_73 [1] : vector<8x8xf32> to vector<8xf32>
    %224 = vector.shape_cast %223 : vector<8xf32> to vector<8x1xf32>
    %225 = tpu.reciprocal %224 : vector<8x1xf32> -> vector<8x1xf32>
    %226 = vector.broadcast %225 : vector<8x1xf32> to vector<8x8xf32>
    %227 = arith.mulf %222, %226 : vector<8x8xf32>
    %228 = vector.extract_strided_slice %184 {offsets = [0, 16], sizes = [8, 8], strides = [1, 1]} : vector<8x32xf32> to vector<8x8xf32>
    %cst_74 = arith.constant dense<0.000000e+00> : vector<8x8xf32>
    %229 = tpu.matmul %227, %228, %cst_74 {dimension_numbers = #tpu.dot_dimension_numbers<[1], [0], [0], [1], [0, 0, 1, 1], [], []>} : vector<8x8xf32>, vector<8x8xf32>, vector<8x8xf32> -> vector<8x8xf32>
    %230 = vector.extract_strided_slice %181 {offsets = [0, 24], sizes = [8, 8], strides = [1, 1]} : vector<8x32xf32> to vector<8x8xf32>
    %231 = vector.extract_strided_slice %183 {offsets = [24, 0], sizes = [8, 8], strides = [1, 1]} : vector<32x8xf32> to vector<8x8xf32>
    %cst_75 = arith.constant dense<0.000000e+00> : vector<8x8xf32>
    %232 = tpu.matmul %230, %231, %cst_75 {dimension_numbers = #tpu.dot_dimension_numbers<[1], [0], [0], [1], [0, 0, 1, 1], [], []>} : vector<8x8xf32>, vector<8x8xf32>, vector<8x8xf32> -> vector<8x8xf32>
    %cst_76 = arith.constant dense<0xFF800000> : vector<8xf32>
    %233 = vector.multi_reduction <maximumf>, %232, %cst_76 [1] : vector<8x8xf32> to vector<8xf32>
    %234 = vector.shape_cast %233 : vector<8xf32> to vector<8x1xf32>
    %235 = vector.broadcast %234 : vector<8x1xf32> to vector<8x8xf32>
    %236 = arith.subf %232, %235 : vector<8x8xf32>
    %237 = math.exp %236 : vector<8x8xf32>
    %cst_77 = arith.constant dense<0.000000e+00> : vector<8xf32>
    %238 = vector.multi_reduction <add>, %237, %cst_77 [1] : vector<8x8xf32> to vector<8xf32>
    %239 = vector.shape_cast %238 : vector<8xf32> to vector<8x1xf32>
    %240 = tpu.reciprocal %239 : vector<8x1xf32> -> vector<8x1xf32>
    %241 = vector.broadcast %240 : vector<8x1xf32> to vector<8x8xf32>
    %242 = arith.mulf %237, %241 : vector<8x8xf32>
    %243 = vector.extract_strided_slice %184 {offsets = [0, 24], sizes = [8, 8], strides = [1, 1]} : vector<8x32xf32> to vector<8x8xf32>
    %cst_78 = arith.constant dense<0.000000e+00> : vector<8x8xf32>
    %244 = tpu.matmul %242, %243, %cst_78 {dimension_numbers = #tpu.dot_dimension_numbers<[1], [0], [0], [1], [0, 0, 1, 1], [], []>} : vector<8x8xf32>, vector<8x8xf32>, vector<8x8xf32> -> vector<8x8xf32>
    %245 = tpu.concatenate %199, %214, %229, %244 in 1 : vector<8x8xf32>, vector<8x8xf32>, vector<8x8xf32>, vector<8x8xf32> -> vector<8x32xf32>
    %246 = vector.extract_strided_slice %173 {offsets = [8, 0], sizes = [8, 32], strides = [1, 1]} : vector<16x32xf32> to vector<8x32xf32>
    %247 = vector.extract_strided_slice %179 {offsets = [8, 0], sizes = [8, 32], strides = [1, 1]} : vector<16x32xf32> to vector<8x32xf32>
    %248 = tpu.transpose %247, [1, 0] : vector<8x32xf32> -> vector<32x8xf32>
    %249 = vector.extract_strided_slice %180 {offsets = [8, 0], sizes = [8, 32], strides = [1, 1]} : vector<16x32xf32> to vector<8x32xf32>
    %250 = vector.extract_strided_slice %246 {offsets = [0, 0], sizes = [8, 8], strides = [1, 1]} : vector<8x32xf32> to vector<8x8xf32>
    %251 = vector.extract_strided_slice %248 {offsets = [0, 0], sizes = [8, 8], strides = [1, 1]} : vector<32x8xf32> to vector<8x8xf32>
    %cst_79 = arith.constant dense<0.000000e+00> : vector<8x8xf32>
    %252 = tpu.matmul %250, %251, %cst_79 {dimension_numbers = #tpu.dot_dimension_numbers<[1], [0], [0], [1], [0, 0, 1, 1], [], []>} : vector<8x8xf32>, vector<8x8xf32>, vector<8x8xf32> -> vector<8x8xf32>
    %cst_80 = arith.constant dense<0xFF800000> : vector<8xf32>
    %253 = vector.multi_reduction <maximumf>, %252, %cst_80 [1] : vector<8x8xf32> to vector<8xf32>
    %254 = vector.shape_cast %253 : vector<8xf32> to vector<8x1xf32>
    %255 = vector.broadcast %254 : vector<8x1xf32> to vector<8x8xf32>
    %256 = arith.subf %252, %255 : vector<8x8xf32>
    %257 = math.exp %256 : vector<8x8xf32>
    %cst_81 = arith.constant dense<0.000000e+00> : vector<8xf32>
    %258 = vector.multi_reduction <add>, %257, %cst_81 [1] : vector<8x8xf32> to vector<8xf32>
    %259 = vector.shape_cast %258 : vector<8xf32> to vector<8x1xf32>
    %260 = tpu.reciprocal %259 : vector<8x1xf32> -> vector<8x1xf32>
    %261 = vector.broadcast %260 : vector<8x1xf32> to vector<8x8xf32>
    %262 = arith.mulf %257, %261 : vector<8x8xf32>
    %263 = vector.extract_strided_slice %249 {offsets = [0, 0], sizes = [8, 8], strides = [1, 1]} : vector<8x32xf32> to vector<8x8xf32>
    %cst_82 = arith.constant dense<0.000000e+00> : vector<8x8xf32>
    %264 = tpu.matmul %262, %263, %cst_82 {dimension_numbers = #tpu.dot_dimension_numbers<[1], [0], [0], [1], [0, 0, 1, 1], [], []>} : vector<8x8xf32>, vector<8x8xf32>, vector<8x8xf32> -> vector<8x8xf32>
    %265 = vector.extract_strided_slice %246 {offsets = [0, 8], sizes = [8, 8], strides = [1, 1]} : vector<8x32xf32> to vector<8x8xf32>
    %266 = vector.extract_strided_slice %248 {offsets = [8, 0], sizes = [8, 8], strides = [1, 1]} : vector<32x8xf32> to vector<8x8xf32>
    %cst_83 = arith.constant dense<0.000000e+00> : vector<8x8xf32>
    %267 = tpu.matmul %265, %266, %cst_83 {dimension_numbers = #tpu.dot_dimension_numbers<[1], [0], [0], [1], [0, 0, 1, 1], [], []>} : vector<8x8xf32>, vector<8x8xf32>, vector<8x8xf32> -> vector<8x8xf32>
    %cst_84 = arith.constant dense<0xFF800000> : vector<8xf32>
    %268 = vector.multi_reduction <maximumf>, %267, %cst_84 [1] : vector<8x8xf32> to vector<8xf32>
    %269 = vector.shape_cast %268 : vector<8xf32> to vector<8x1xf32>
    %270 = vector.broadcast %269 : vector<8x1xf32> to vector<8x8xf32>
    %271 = arith.subf %267, %270 : vector<8x8xf32>
    %272 = math.exp %271 : vector<8x8xf32>
    %cst_85 = arith.constant dense<0.000000e+00> : vector<8xf32>
    %273 = vector.multi_reduction <add>, %272, %cst_85 [1] : vector<8x8xf32> to vector<8xf32>
    %274 = vector.shape_cast %273 : vector<8xf32> to vector<8x1xf32>
    %275 = tpu.reciprocal %274 : vector<8x1xf32> -> vector<8x1xf32>
    %276 = vector.broadcast %275 : vector<8x1xf32> to vector<8x8xf32>
    %277 = arith.mulf %272, %276 : vector<8x8xf32>
    %278 = vector.extract_strided_slice %249 {offsets = [0, 8], sizes = [8, 8], strides = [1, 1]} : vector<8x32xf32> to vector<8x8xf32>
    %cst_86 = arith.constant dense<0.000000e+00> : vector<8x8xf32>
    %279 = tpu.matmul %277, %278, %cst_86 {dimension_numbers = #tpu.dot_dimension_numbers<[1], [0], [0], [1], [0, 0, 1, 1], [], []>} : vector<8x8xf32>, vector<8x8xf32>, vector<8x8xf32> -> vector<8x8xf32>
    %280 = vector.extract_strided_slice %246 {offsets = [0, 16], sizes = [8, 8], strides = [1, 1]} : vector<8x32xf32> to vector<8x8xf32>
    %281 = vector.extract_strided_slice %248 {offsets = [16, 0], sizes = [8, 8], strides = [1, 1]} : vector<32x8xf32> to vector<8x8xf32>
    %cst_87 = arith.constant dense<0.000000e+00> : vector<8x8xf32>
    %282 = tpu.matmul %280, %281, %cst_87 {dimension_numbers = #tpu.dot_dimension_numbers<[1], [0], [0], [1], [0, 0, 1, 1], [], []>} : vector<8x8xf32>, vector<8x8xf32>, vector<8x8xf32> -> vector<8x8xf32>
    %cst_88 = arith.constant dense<0xFF800000> : vector<8xf32>
    %283 = vector.multi_reduction <maximumf>, %282, %cst_88 [1] : vector<8x8xf32> to vector<8xf32>
    %284 = vector.shape_cast %283 : vector<8xf32> to vector<8x1xf32>
    %285 = vector.broadcast %284 : vector<8x1xf32> to vector<8x8xf32>
    %286 = arith.subf %282, %285 : vector<8x8xf32>
    %287 = math.exp %286 : vector<8x8xf32>
    %cst_89 = arith.constant dense<0.000000e+00> : vector<8xf32>
    %288 = vector.multi_reduction <add>, %287, %cst_89 [1] : vector<8x8xf32> to vector<8xf32>
    %289 = vector.shape_cast %288 : vector<8xf32> to vector<8x1xf32>
    %290 = tpu.reciprocal %289 : vector<8x1xf32> -> vector<8x1xf32>
    %291 = vector.broadcast %290 : vector<8x1xf32> to vector<8x8xf32>
    %292 = arith.mulf %287, %291 : vector<8x8xf32>
    %293 = vector.extract_strided_slice %249 {offsets = [0, 16], sizes = [8, 8], strides = [1, 1]} : vector<8x32xf32> to vector<8x8xf32>
    %cst_90 = arith.constant dense<0.000000e+00> : vector<8x8xf32>
    %294 = tpu.matmul %292, %293, %cst_90 {dimension_numbers = #tpu.dot_dimension_numbers<[1], [0], [0], [1], [0, 0, 1, 1], [], []>} : vector<8x8xf32>, vector<8x8xf32>, vector<8x8xf32> -> vector<8x8xf32>
    %295 = vector.extract_strided_slice %246 {offsets = [0, 24], sizes = [8, 8], strides = [1, 1]} : vector<8x32xf32> to vector<8x8xf32>
    %296 = vector.extract_strided_slice %248 {offsets = [24, 0], sizes = [8, 8], strides = [1, 1]} : vector<32x8xf32> to vector<8x8xf32>
    %cst_91 = arith.constant dense<0.000000e+00> : vector<8x8xf32>
    %297 = tpu.matmul %295, %296, %cst_91 {dimension_numbers = #tpu.dot_dimension_numbers<[1], [0], [0], [1], [0, 0, 1, 1], [], []>} : vector<8x8xf32>, vector<8x8xf32>, vector<8x8xf32> -> vector<8x8xf32>
    %cst_92 = arith.constant dense<0xFF800000> : vector<8xf32>
    %298 = vector.multi_reduction <maximumf>, %297, %cst_92 [1] : vector<8x8xf32> to vector<8xf32>
    %299 = vector.shape_cast %298 : vector<8xf32> to vector<8x1xf32>
    %300 = vector.broadcast %299 : vector<8x1xf32> to vector<8x8xf32>
    %301 = arith.subf %297, %300 : vector<8x8xf32>
    %302 = math.exp %301 : vector<8x8xf32>
    %cst_93 = arith.constant dense<0.000000e+00> : vector<8xf32>
    %303 = vector.multi_reduction <add>, %302, %cst_93 [1] : vector<8x8xf32> to vector<8xf32>
    %304 = vector.shape_cast %303 : vector<8xf32> to vector<8x1xf32>
    %305 = tpu.reciprocal %304 : vector<8x1xf32> -> vector<8x1xf32>
    %306 = vector.broadcast %305 : vector<8x1xf32> to vector<8x8xf32>
    %307 = arith.mulf %302, %306 : vector<8x8xf32>
    %308 = vector.extract_strided_slice %249 {offsets = [0, 24], sizes = [8, 8], strides = [1, 1]} : vector<8x32xf32> to vector<8x8xf32>
    %cst_94 = arith.constant dense<0.000000e+00> : vector<8x8xf32>
    %309 = tpu.matmul %307, %308, %cst_94 {dimension_numbers = #tpu.dot_dimension_numbers<[1], [0], [0], [1], [0, 0, 1, 1], [], []>} : vector<8x8xf32>, vector<8x8xf32>, vector<8x8xf32> -> vector<8x8xf32>
    %310 = tpu.concatenate %264, %279, %294, %309 in 1 : vector<8x8xf32>, vector<8x8xf32>, vector<8x8xf32>, vector<8x8xf32> -> vector<8x32xf32>
    %311 = tpu.concatenate %245, %310 in 0 : vector<8x32xf32>, vector<8x32xf32> -> vector<16x32xf32>
    %c0_95 = arith.constant 0 : index
    %c0_96 = arith.constant 0 : index
    %312 = vector.load %arg11[%c0_95, %c0_96] : memref<32x32xf32, #tpu.memory_space<vmem>>, vector<32x32xf32>
    %cst_97 = arith.constant dense<0.000000e+00> : vector<16x32xf32>
    %313 = tpu.matmul %311, %312, %cst_97 {dimension_numbers = #tpu.dot_dimension_numbers<[1], [0], [0], [1], [0, 0, 1, 1], [], []>} : vector<16x32xf32>, vector<32x32xf32>, vector<16x32xf32> -> vector<16x32xf32>
    %c0_98 = arith.constant 0 : index
    %c0_99 = arith.constant 0 : index
    %314 = vector.load %arg12[%c0_98, %c0_99] : memref<1x32xf32, #tpu.memory_space<vmem>>, vector<1x32xf32>
    %315 = vector.broadcast %314 : vector<1x32xf32> to vector<16x32xf32>
    %316 = arith.addf %313, %315 : vector<16x32xf32>
    %317 = arith.addf %168, %316 : vector<16x32xf32>
    %cst_100 = arith.constant dense<0.000000e+00> : vector<16xf32>
    %318 = vector.multi_reduction <add>, %317, %cst_100 [1] : vector<16x32xf32> to vector<16xf32>
    %319 = vector.shape_cast %318 : vector<16xf32> to vector<16x1xf32>
    %cst_101 = arith.constant 3.200000e+01 : f32
    %320 = vector.broadcast %cst_101 : f32 to vector<16x1xf32>
    %321 = arith.divf %319, %320 : vector<16x1xf32>
    %322 = vector.broadcast %321 : vector<16x1xf32> to vector<16x32xf32>
    %323 = arith.subf %317, %322 : vector<16x32xf32>
    %324 = arith.mulf %323, %323 : vector<16x32xf32>
    %cst_102 = arith.constant dense<0.000000e+00> : vector<16xf32>
    %325 = vector.multi_reduction <add>, %324, %cst_102 [1] : vector<16x32xf32> to vector<16xf32>
    %326 = vector.shape_cast %325 : vector<16xf32> to vector<16x1xf32>
    %cst_103 = arith.constant 3.200000e+01 : f32
    %327 = vector.broadcast %cst_103 : f32 to vector<16x1xf32>
    %328 = arith.divf %326, %327 : vector<16x1xf32>
    %cst_104 = arith.constant 9.99999974E-6 : f32
    %329 = vector.broadcast %cst_104 : f32 to vector<16x1xf32>
    %330 = arith.addf %328, %329 : vector<16x1xf32>
    %331 = math.rsqrt %330 : vector<16x1xf32>
    %332 = vector.broadcast %331 : vector<16x1xf32> to vector<16x32xf32>
    %333 = arith.mulf %323, %332 : vector<16x32xf32>
    %334 = vector.broadcast %2 : vector<1x32xf32> to vector<16x32xf32>
    %335 = arith.mulf %333, %334 : vector<16x32xf32>
    %336 = vector.broadcast %3 : vector<1x32xf32> to vector<16x32xf32>
    %337 = arith.addf %335, %336 : vector<16x32xf32>
    %c0_105 = arith.constant 0 : index
    %c0_106 = arith.constant 0 : index
    %338 = vector.load %arg13[%c0_105, %c0_106] : memref<32x64xf32, #tpu.memory_space<vmem>>, vector<32x64xf32>
    %cst_107 = arith.constant dense<0.000000e+00> : vector<16x64xf32>
    %339 = tpu.matmul %337, %338, %cst_107 {dimension_numbers = #tpu.dot_dimension_numbers<[1], [0], [0], [1], [0, 0, 1, 1], [], []>} : vector<16x32xf32>, vector<32x64xf32>, vector<16x64xf32> -> vector<16x64xf32>
    %c0_108 = arith.constant 0 : index
    %c0_109 = arith.constant 0 : index
    %340 = vector.load %arg14[%c0_108, %c0_109] : memref<1x64xf32, #tpu.memory_space<vmem>>, vector<1x64xf32>
    %341 = vector.broadcast %340 : vector<1x64xf32> to vector<16x64xf32>
    %342 = arith.addf %339, %341 : vector<16x64xf32>
    %cst_110 = arith.constant 0.000000e+00 : f32
    %343 = vector.broadcast %cst_110 : f32 to vector<16x64xf32>
    %344 = arith.maximumf %342, %343 : vector<16x64xf32>
    %c0_111 = arith.constant 0 : index
    %c0_112 = arith.constant 0 : index
    %345 = vector.load %arg15[%c0_111, %c0_112] : memref<64x32xf32, #tpu.memory_space<vmem>>, vector<64x32xf32>
    %cst_113 = arith.constant dense<0.000000e+00> : vector<16x32xf32>
    %346 = tpu.matmul %344, %345, %cst_113 {dimension_numbers = #tpu.dot_dimension_numbers<[1], [0], [0], [1], [0, 0, 1, 1], [], []>} : vector<16x64xf32>, vector<64x32xf32>, vector<16x32xf32> -> vector<16x32xf32>
    %c0_114 = arith.constant 0 : index
    %c0_115 = arith.constant 0 : index
    %347 = vector.load %arg16[%c0_114, %c0_115] : memref<1x32xf32, #tpu.memory_space<vmem>>, vector<1x32xf32>
    %348 = vector.broadcast %347 : vector<1x32xf32> to vector<16x32xf32>
    %349 = arith.addf %346, %348 : vector<16x32xf32>
    %350 = arith.addf %337, %349 : vector<16x32xf32>
    %cst_116 = arith.constant dense<0.000000e+00> : vector<16xf32>
    %351 = vector.multi_reduction <add>, %350, %cst_116 [1] : vector<16x32xf32> to vector<16xf32>
    %352 = vector.shape_cast %351 : vector<16xf32> to vector<16x1xf32>
    %cst_117 = arith.constant 3.200000e+01 : f32
    %353 = vector.broadcast %cst_117 : f32 to vector<16x1xf32>
    %354 = arith.divf %352, %353 : vector<16x1xf32>
    %355 = vector.broadcast %354 : vector<16x1xf32> to vector<16x32xf32>
    %356 = arith.subf %350, %355 : vector<16x32xf32>
    %357 = arith.mulf %356, %356 : vector<16x32xf32>
    %cst_118 = arith.constant dense<0.000000e+00> : vector<16xf32>
    %358 = vector.multi_reduction <add>, %357, %cst_118 [1] : vector<16x32xf32> to vector<16xf32>
    %359 = vector.shape_cast %358 : vector<16xf32> to vector<16x1xf32>
    %cst_119 = arith.constant 3.200000e+01 : f32
    %360 = vector.broadcast %cst_119 : f32 to vector<16x1xf32>
    %361 = arith.divf %359, %360 : vector<16x1xf32>
    %cst_120 = arith.constant 9.99999974E-6 : f32
    %362 = vector.broadcast %cst_120 : f32 to vector<16x1xf32>
    %363 = arith.addf %361, %362 : vector<16x1xf32>
    %364 = math.rsqrt %363 : vector<16x1xf32>
    %365 = vector.broadcast %364 : vector<16x1xf32> to vector<16x32xf32>
    %366 = arith.mulf %356, %365 : vector<16x32xf32>
    %367 = vector.broadcast %2 : vector<1x32xf32> to vector<16x32xf32>
    %368 = arith.mulf %366, %367 : vector<16x32xf32>
    %369 = vector.broadcast %3 : vector<1x32xf32> to vector<16x32xf32>
    %370 = arith.addf %368, %369 : vector<16x32xf32>
    %c0_121 = arith.constant 0 : index
    %c0_122 = arith.constant 0 : index
    %371 = vector.load %arg19[%c0_121, %c0_122] : memref<16x32xf32, #tpu.memory_space<vmem>>, vector<16x32xf32>
    tpu.vector_store %arg19[%c0_121, %c0_122], %370 {strides = array<i32>} : memref<16x32xf32, #tpu.memory_space<vmem>>, vector<16x32xf32>,
    return
  }
  func.func @transform_0(%arg0: i32) -> (i32, i32) {
    %c0_i32 = arith.constant 0 : i32
    %c0_i32_0 = arith.constant 0 : i32
    %c0_i32_1 = arith.constant 0 : i32
    return %c0_i32, %c0_i32_0 : i32, i32
  }
  func.func @transform_1(%arg0: i32) -> (i32, i32) {
    %c0_i32 = arith.constant 0 : i32
    %c0_i32_0 = arith.constant 0 : i32
    %c0_i32_1 = arith.constant 0 : i32
    return %c0_i32, %c0_i32_0 : i32, i32
  }
  func.func @transform_2(%arg0: i32) -> (i32, i32) {
    %c0_i32 = arith.constant 0 : i32
    %c0_i32_0 = arith.constant 0 : i32
    %c0_i32_1 = arith.constant 0 : i32
    return %c0_i32, %c0_i32_0 : i32, i32
  }
  func.func @transform_3(%arg0: i32) -> (i32, i32) {
    %c0_i32 = arith.constant 0 : i32
    %c0_i32_0 = arith.constant 0 : i32
    %c0_i32_1 = arith.constant 0 : i32
    return %c0_i32, %c0_i32_0 : i32, i32
  }
  func.func @transform_4(%arg0: i32) -> (i32, i32) {
    %c0_i32 = arith.constant 0 : i32
    %c0_i32_0 = arith.constant 0 : i32
    %c0_i32_1 = arith.constant 0 : i32
    return %c0_i32, %c0_i32_0 : i32, i32
  }
  func.func @transform_5(%arg0: i32) -> (i32, i32) {
    %c0_i32 = arith.constant 0 : i32
    %c0_i32_0 = arith.constant 0 : i32
    %c0_i32_1 = arith.constant 0 : i32
    return %c0_i32, %c0_i32_0 : i32, i32
  }
  func.func @transform_6(%arg0: i32) -> (i32, i32) {
    %c0_i32 = arith.constant 0 : i32
    %c0_i32_0 = arith.constant 0 : i32
    %c0_i32_1 = arith.constant 0 : i32
    return %c0_i32, %c0_i32_0 : i32, i32
  }
  func.func @transform_7(%arg0: i32) -> (i32, i32) {
    %c0_i32 = arith.constant 0 : i32
    %c0_i32_0 = arith.constant 0 : i32
    %c0_i32_1 = arith.constant 0 : i32
    return %c0_i32, %c0_i32_0 : i32, i32
  }
  func.func @transform_8(%arg0: i32) -> (i32, i32) {
    %c0_i32 = arith.constant 0 : i32
    %c0_i32_0 = arith.constant 0 : i32
    %c0_i32_1 = arith.constant 0 : i32
    return %c0_i32, %c0_i32_0 : i32, i32
  }
  func.func @transform_9(%arg0: i32) -> (i32, i32) {
    %c0_i32 = arith.constant 0 : i32
    %c0_i32_0 = arith.constant 0 : i32
    %c0_i32_1 = arith.constant 0 : i32
    return %c0_i32, %c0_i32_0 : i32, i32
  }
  func.func @transform_10(%arg0: i32) -> (i32, i32) {
    %c0_i32 = arith.constant 0 : i32
    %c0_i32_0 = arith.constant 0 : i32
    %c0_i32_1 = arith.constant 0 : i32
    return %c0_i32, %c0_i32_0 : i32, i32
  }
  func.func @transform_11(%arg0: i32) -> (i32, i32) {
    %c0_i32 = arith.constant 0 : i32
    %c0_i32_0 = arith.constant 0 : i32
    %c0_i32_1 = arith.constant 0 : i32
    return %c0_i32, %c0_i32_0 : i32, i32
  }
  func.func @transform_12(%arg0: i32) -> (i32, i32) {
    %c0_i32 = arith.constant 0 : i32
    %c0_i32_0 = arith.constant 0 : i32
    %c0_i32_1 = arith.constant 0 : i32
    return %c0_i32, %c0_i32_0 : i32, i32
  }
  func.func @transform_13(%arg0: i32) -> (i32, i32) {
    %c0_i32 = arith.constant 0 : i32
    %c0_i32_0 = arith.constant 0 : i32
    %c0_i32_1 = arith.constant 0 : i32
    return %c0_i32, %c0_i32_0 : i32, i32
  }
  func.func @transform_14(%arg0: i32) -> (i32, i32) {
    %c0_i32 = arith.constant 0 : i32
    %c0_i32_0 = arith.constant 0 : i32
    %c0_i32_1 = arith.constant 0 : i32
    return %c0_i32, %c0_i32_0 : i32, i32
  }
  func.func @transform_15(%arg0: i32) -> (i32, i32) {
    %c0_i32 = arith.constant 0 : i32
    %c0_i32_0 = arith.constant 0 : i32
    %c0_i32_1 = arith.constant 0 : i32
    return %c0_i32, %c0_i32_0 : i32, i32
  }
  func.func @transform_16(%arg0: i32) -> (i32, i32) {
    %c0_i32 = arith.constant 0 : i32
    %c0_i32_0 = arith.constant 0 : i32
    %c0_i32_1 = arith.constant 0 : i32
    return %c0_i32, %c0_i32_0 : i32, i32
  }
  func.func @transform_17(%arg0: i32) -> (i32, i32) {
    %c0_i32 = arith.constant 0 : i32
    %c0_i32_0 = arith.constant 0 : i32
    %c0_i32_1 = arith.constant 0 : i32
    return %c0_i32, %c0_i32_0 : i32, i32
  }
  func.func @transform_18(%arg0: i32) -> (i32, i32) {
    %c0_i32 = arith.constant 0 : i32
    %c0_i32_0 = arith.constant 0 : i32
    %c0_i32_1 = arith.constant 0 : i32
    return %c0_i32, %c0_i32_0 : i32, i32
  }
}

</mosaic_0001>

<bundles_post_ra>
// kernel: tpu_custom_call.1
= control target key start
LH: loop header
LB: loop body
LE: loop exit
PB: predicated region body
PF: predicated region fallthrough
CT: control target
= control target key end

     0   :  { %s2835_s0 = inlined_call_operand.hbm [shape: f32[16,32], index: 0, kind: input, shape index: {}]   ;;  %s2836_s1 = inlined_call_operand.hbm [shape: f32[16,32], index: 1, kind: input, shape index: {}]   ;;  %s2837_s2 = inlined_call_operand.vmem [shape: f32[32,96], index: 2, kind: input, shape index: {}]   ;;  %s2838_s3 = inlined_call_operand.vmem [shape: f32[1,96], index: 3, kind: input, shape index: {}]   ;;  %s2839_s4 = inlined_call_operand.vmem [shape: f32[32,32], index: 4, kind: input, shape index: {}]   ;;  %s2840_s5 = inlined_call_operand.vmem [shape: f32[1,32], index: 5, kind: input, shape index: {}]   ;;  %s2841_s6 = inlined_call_operand.vmem [shape: f32[32,32], index: 6, kind: input, shape index: {}]   ;;  %s2842_s7 = inlined_call_operand.vmem [shape: f32[1,32], index: 7, kind: input, shape index: {}]   ;;  %s2843_s8 = inlined_call_operand.hbm [shape: f32[32,64], index: 8, kind: input, shape index: {}]   ;;  %s2844_s9 = inlined_call_operand.vmem [shape: f32[1,64], index: 9, kind: input, shape index: {}]   ;;  %s2845_s10 = inlined_call_operand.hbm [shape: f32[32,32], index: 10, kind: input, shape index: {}]   ;;  %s2846_s11 = inlined_call_operand.vmem [shape: f32[1,32], index: 11, kind: input, shape index: {}]   ;;  %s2847_s12 = inlined_call_operand.hbm [shape: f32[32,64], index: 12, kind: input, shape index: {}]   ;;  %s2848_s13 = inlined_call_operand.vmem [shape: f32[1,64], index: 13, kind: input, shape index: {}]   ;;  %s2849_s14 = inlined_call_operand.vmem [shape: f32[64,32], index: 14, kind: input, shape index: {}]   ;;  %s2850_s15 = inlined_call_operand.vmem [shape: f32[1,32], index: 15, kind: input, shape index: {}]   ;;  %s2851_s16 = inlined_call_operand.vmem [shape: f32[1,32], index: 16, kind: input, shape index: {}]   ;;  %s2852_s17 = inlined_call_operand.vmem [shape: f32[1,32], index: 17, kind: input, shape index: {}]   ;;  %s2853_s18 = inlined_call_operand.hbm [shape: f32[16,32], index: 18, kind: output, shape index: {}]  }
   0x1   :  { %2855 = sst [smem:[#allocation16_spill]] %s2835_s0 }
   0x2   :  { %2856 = sst [smem:[#allocation17_spill]] %s2836_s1 }
   0x3   :  { %2857 = sst [smem:[#allocation18_spill]] %s2837_s2 }
   0x4   :  { %23 = vsyncpa [#allocation3], 0 }
   0x5   :  { %24 = vsyncpa [#allocation6], 0 }
   0x6   :  { %25 = vsyncpa [#allocation9], 0 }
   0x7   :  { %26 = vsyncpa [#allocation4], 0  ;;  %s2858_s29 = sld [smem:[#allocation17_spill]]  ;;  %s2226_s0 = smov [#allocation5]  }
   0x8   :  { %s46_s19 = sshll.u32 %s2226_s0, 4  ;;  %s84_s21 = sshll.u32 %s2845_s10, 4  ;;  %s47_s19 = int_to_ptr.vmem [resolvable:$true] %s46_s19  ;;  %s85_s21 = int_to_ptr.hbm [resolvable:$true] %s84_s21 }
   0x9   :  { %s2227_s22 = smov 128   ;;  %s2228_s2 = smov 8  }
   0xa   :  { %s2229_s23 = smov [#allocation8]   ;;  %s2859_s27 = sld [smem:[#allocation16_spill]] }
   0xb   :  { %s86_s24 = sshll.u32 %s2229_s23, 4  ;;  %s69_s0 = sshll.u32 %s2843_s8, 4  ;;  %s87_s24 = int_to_ptr.vmem [resolvable:$true] %s86_s24  ;;  %s70_s0 = int_to_ptr.hbm [resolvable:$true] %s69_s0 }
   0xc   :  { %92 = dma.hbm_to_vmem [thread:$0]  %s85_s21, 512, %s87_s24, [#allocation9], %s2227_s22, %s2227_s22, %s2228_s2  }
   0xd   :  { %s44_s30 = sshll.u32 %s2858_s29, 4  ;;  %s2230_s1 = smov [#allocation2]   ;;  %s45_s30 = int_to_ptr.hbm [resolvable:$true] %s44_s30 }
   0xe   :  { %52 = dma.hbm_to_vmem [thread:$0]  %s45_s30, 256, %s47_s19, [#allocation6], %s2227_s22, %s2227_s22, %s2228_s2  }
   0xf   :  { %s33_s20 = sshll.u32 %s2230_s1, 4  ;;  %s2231_s30 = smov [#allocation7]   ;;  %s34_s20 = int_to_ptr.vmem [resolvable:$true] %s33_s20 }
  0x10   :  { %s31_s28 = sshll.u32 %s2859_s27, 4  ;;  %s71_s19 = sshll.u32 %s2231_s30, 4  ;;  %s32_s28 = int_to_ptr.hbm [resolvable:$true] %s31_s28  ;;  %s72_s19 = int_to_ptr.vmem [resolvable:$true] %s71_s19 }
  0x11   :  { %39 = dma.hbm_to_vmem [thread:$0]  %s32_s28, 256, %s34_s20, [#allocation3], %s2227_s22, %s2227_s22, %s2228_s2  }
  0x12   :  { %s99_s26 = sshll.u32 %s2847_s12, 4  ;;  %s2232_s8 = smov [#allocation10]   ;;  %s100_s26 = int_to_ptr.hbm [resolvable:$true] %s99_s26 }
  0x13   :  { %77 = dma.hbm_to_vmem [thread:$0]  %s70_s0, 512, %s72_s19, [#allocation6], %s2227_s22, %s2227_s22, %s2228_s2  }
  0x14   :  { %s101_s21 = sshll.u32 %s2232_s8, 4  ;;  %s102_s21 = int_to_ptr.vmem [resolvable:$true] %s101_s21 }
  0x15   :  { %107 = dma.hbm_to_vmem [thread:$0]  %s100_s26, 512, %s102_s21, [#allocation9], %s2227_s22, %s2227_s22, %s2228_s2  }
  0x16   :  { %2218 = dma.done.wait [#allocation3], 256  }
  0x17   :  { %2219 = vsyncadd [#allocation3], 4294967040 }
  0x18   :  { %2220 = dma.done.wait [#allocation6], 768  }
  0x19   :  { %2221 = vsyncadd [#allocation6], 4294966528 }
  0x1a   :  { %2222 = dma.done.wait [#allocation9], 1024  }
  0x1b   :  { %2223 = vsyncadd [#allocation9], 4294966272  ;;  %s2860_s27 = sld [smem:[#allocation18_spill]]  ;;  %v2385_v4 = vld [vmem:[#allocation2] sm:$0xff]  ;;  %vm152_vm0 = vcmask 261120   ;;  %s2233_s23 = smov 112  }
  0x1c   :  { %v1986_v5 = vld [vmem:[%s2838_s3] ss:$0 sm:$0xff]  ;;  %s2234_s25 = smov 120   ;;  %s2235_s26 = smov 96   ;;  %v2404_v8 = vld [vmem:[#allocation2 + $0x8] sm:$0xff]  ;;  %vm185_vm1 = vcmask 64512  }
  0x1d   :  { %s2236_s8 = smov 80   ;;  %s2237_s3 = smov 88  }
  0x1e   :  { %s2238_s21 = smov 56   ;;  %s2239_s12 = smov 72  }
  0x1f   :  { %s2240_s24 = smov 64   ;;  %s2242_s28 = smov 48  }
  0x20   :  { %s2243_s10 = smov 40   ;;  %s2244_s29 = smov 16  }
  0x21   :  { %v147_v0 = vld [vmem:[%s2860_s27 + $0x18] sm:$0xff]  ;;  %v146_v1 = vld [vmem:[%s2860_s27 + $0x10] sm:$0xff]  ;;  %v145_v2 = vld [vmem:[%s2860_s27 + $0x8] sm:$0xff] }
  0x22   :  { %171 = vmatpush.msra.mxu0 %v147_v0  ;;  %v144_v3 = vld [vmem:[%s2860_s27] sm:$0xff]  ;;  %s2241_s27 = smov 104  }
  0x24   :  { %172 = vmatpush.msra.mxu0 %v146_v1 }
  0x26   :  { %173 = vmatpush.msra.mxu0 %v145_v2 }
  0x28   :  { %174 = vmatpush.msra.mxu0 %v144_v3 }
  0x29   :  { %1902 = vmatmul.msk.f32.vlgmr.msra.gmra.mxu0 %vm152_vm0, %v2385_v4 }
  0x31   :  { %1903 = vmatmul.msk.f32.gmra.mxu0 %vm152_vm0, %v2404_v8 }
  0xa6   :  { %v176_v6 = vpop.f32.mrf.mxu0 }
  0xa7   :  { %v2392_v7 = vadd.f32 %v1986_v5, %v176_v6 }
  0xa9   :  { %338 = vrot.lane.b32.xlu2 %v2392_v7, %s2233_s23  ;;  %260 = vrot.lane.b32.xlu1 %v2392_v7, %s2234_s25 }
  0xaa   :  { %183 = vrot.lane.b32.xlu0 %v2392_v7, %s2235_s26 }
  0xae   :  { %v179_v14 = vpop.f32.mrf.mxu0 }
  0xaf   :  { %v2422_v21 = vadd.f32 %v1986_v5, %v179_v14 }
  0xb1   :  { %340 = vrot.lane.b32.xlu1 %v2392_v7, %s2236_s8 }
  0xb2   :  { %262 = vrot.lane.b32.xlu0 %v2392_v7, %s2237_s3 }
 0x103   :  { %v339_v13 = vpop.permute.xlu2 %338 }
 0x11b   :  { %v261_v9 = vpop.permute.xlu1 %260 }
 0x11c   :  { %v184_v10 = vpop.permute.xlu0 %183 }
 0x11d   :  { %1904 = vmatpush.xpose.msk.msra.mxu1 %vm185_vm1, %v184_v10 }
 0x120   :  { %1905 = vmatmul.msk.f32.vlgmr.msra.gmra.mxu1 %vm185_vm1, %v2392_v7 }
 0x123   :  { %v341_v11 = vpop.permute.xlu1 %340 }
 0x124   :  { %v263_v12 = vpop.permute.xlu0 %262  ;;  %1910 = vmatpush.xpose.msk.msrb.mxu1 %vm185_vm1, %v341_v11 }
 0x125   :  { %1907 = vmatpush.xpose.msk.msrb.mxu0 %vm185_vm1, %v263_v12 }
 0x128   :  { %1908 = vmatmul.msk.f32.vlgmr.msrb.gmra.mxu0 %vm185_vm1, %v261_v9  ;;  %1911 = vmatmul.msk.f32.vlgmr.msrb.gmra.mxu1 %vm185_vm1, %v339_v13 }
 0x19d   :  { %v207_v15 = vpop.f32.mrf.mxu1 }
 0x19e   :  { %v210_v16 = vsel %vm185_vm1, %v207_v15, -inf }
 0x19f   :  { %211 = vmax.xlane.f32.xlu2 %v210_v16 }
 0x1a5   :  { %v285_v17 = vpop.f32.mrf.mxu0  ;;  %v363_v18 = vpop.f32.mrf.mxu1 }
 0x1a6   :  { %v366_v19 = vsel %vm185_vm1, %v363_v18, -inf  ;;  %v288_v20 = vsel %vm185_vm1, %v285_v17, -inf }
 0x1a7   :  { %367 = vmax.xlane.f32.xlu1 %v366_v19  ;;  %289 = vmax.xlane.f32.xlu0 %v288_v20 }
 0x1b7   :  { %312 = vrot.lane.b32.xlu2 %v2392_v7, %s2238_s21 }
 0x1bb   :  { %418 = vrot.lane.b32.xlu0 %v2392_v7, %s2239_s12 }
 0x1bf   :  { %512 = vrot.lane.b32.xlu2 %v2422_v21, %s2235_s26 }
 0x1c0   :  { %234 = vrot.lane.b32.xlu1 %v2392_v7, %s2240_s24 }
 0x1c3   :  { %416 = vrot.lane.b32.xlu0 %v2392_v7, %s2241_s27 }
 0x1c8   :  { %390 = vrot.lane.b32.xlu1 %v2392_v7, %s2242_s28 }
 0x1cb   :  { %588 = vrot.lane.b32.xlu0 %v2422_v21, %s2234_s25 }
 0x1d0   :  { %590 = vrot.lane.b32.xlu1 %v2422_v21, %s2237_s3 }
 0x1d8   :  { %746 = vrot.lane.b32.xlu1 %v2422_v21, %s2239_s12 }
 0x212   :  { %v212_v22 = vpop.xlane.xlu2 %211 }
 0x213   :  { %v213_v23 = vsub.f32 %v207_v15, %v212_v22 }
 0x215   :  { %v214_v24 = vmul.f32 1.442695, %v213_v23 }
 0x217   :  { %1995 = vpow2.f32 %v214_v24 }
 0x21a   :  { %v368_v25 = vpop.xlane.xlu1 %367  ;;  %v290_v27 = vpop.xlane.xlu0 %289 }
 0x21b   :  { %v369_v26 = vsub.f32 %v363_v18, %v368_v25  ;;  %v291_v28 = vsub.f32 %v285_v17, %v290_v27  ;;  %v313_v37 = vpop.permute.xlu2 %312 }
 0x21d   :  { %v1996_v29 = vpop.eup %1995  ;;  %v370_v30 = vmul.f32 1.442695, %v369_v26  ;;  %v292_v31 = vmul.f32 1.442695, %v291_v28 }
 0x21e   :  { %v216_v32 = vsel %vm185_vm1, %v1996_v29, 0.0 }
 0x21f   :  { %1997 = vpow2.f32 %v370_v30  ;;  %217 = vadd.xlane.f32.xlu2 %v216_v32 }
 0x220   :  { %1999 = vpow2.f32 %v292_v31 }
 0x223   :  { %v513_v40 = vpop.permute.xlu2 %512 }
 0x225   :  { %v2439_v33 = vpop.eup %1997 }
 0x226   :  { %v2441_v34 = vpop.eup %1999  ;;  %v372_v35 = vsel %vm185_vm1, %v2439_v33, 0.0 }
 0x227   :  { %373 = vadd.xlane.f32.xlu0 %v372_v35  ;;  %v294_v36 = vsel %vm185_vm1, %v2441_v34, 0.0 }
 0x228   :  { %295 = vadd.xlane.f32.xlu2 %v294_v36 }
 0x22d   :  { %v419_v41 = vpop.permute.xlu0 %418 }
 0x232   :  { %v235_v38 = vpop.permute.xlu1 %234 }
 0x233   :  { %255 = vmatpush.msra.mxu2 %v235_v38 }
 0x235   :  { %333 = vmatpush.msrb.mxu2 %v313_v37  ;;  %v2454_v42 = vpop.permute.xlu0 %416 }
 0x23a   :  { %v391_v39 = vpop.permute.xlu1 %390 }
 0x23b   :  { %411 = vmatpush.msra.mxu3 %v391_v39  ;;  %666 = vrot.lane.b32.xlu0 %v2422_v21, %s2233_s23 }
 0x23d   :  { %1916 = vmatpush.xpose.msk.msrb.mxu3 %vm185_vm1, %v513_v40  ;;  %v2456_v43 = vpop.permute.xlu0 %588 }
 0x240   :  { %668 = vrot.lane.b32.xlu2 %v2422_v21, %s2236_s8 }
 0x242   :  { %v591_v18 = vpop.permute.xlu1 %590 }
 0x248   :  { %744 = vrot.lane.b32.xlu2 %v2422_v21, %s2241_s27 }
 0x24a   :  { %v747_v22 = vpop.permute.xlu1 %746 }
 0x292   :  { %v218_v44 = vpop.xlane.xlu2 %217 }
 0x293   :  { %2001 = vrcp.f32 %v218_v44  ;;  %v230_v50 = vand.u32 2147483648, %v218_v44  ;;  %v228_v52 = vand.u32 2147483647, %v218_v44  ;;  %vm224_vm3 = vweird.f32 %v218_v44 }
 0x295   :  { %v231_v55 = vor.u32 1.1754944e-38, %v230_v50  ;;  %vm229_vm5 = vcmp.eq.f32.partialorder %v228_v52, 8.507059e+37 }
 0x299   :  { %v2002_v45 = vpop.eup %2001 }
 0x29a   :  { %v220_v46 = vmul.f32 %v2002_v45, %v218_v44  ;;  %v374_v47 = vpop.xlane.xlu0 %373  ;;  %vm225_vm2 = vweird.f32 %v2002_v45 }
 0x29b   :  { %v296_v48 = vpop.xlane.xlu2 %295  ;;  %2003 = vrcp.f32 %v374_v47  ;;  %vm226_vm4 = vmor %vm224_vm3, %vm225_vm2  ;;  %v386_v0 = vand.u32 2147483648, %v374_v47  ;;  %v384_v3 = vand.u32 2147483647, %v374_v47  ;;  %vm380_vm8 = vweird.f32 %v374_v47 }
 0x29c   :  { %v221_v49 = vsub.f32 1.0, %v220_v46  ;;  %2005 = vrcp.f32 %v296_v48  ;;  %v308_v1 = vand.u32 2147483648, %v296_v48  ;;  %v306_v6 = vand.u32 2147483647, %v296_v48 }
 0x29d   :  { %vm302_vm9 = vweird.f32 %v296_v48  ;;  %v387_v11 = vor.u32 1.1754944e-38, %v386_v0  ;;  %vm385_vm12 = vcmp.eq.f32.partialorder %v384_v3, 8.507059e+37 }
 0x29e   :  { %v222_v51 = vmul.f32 %v2002_v45, %v221_v49  ;;  %v309_v12 = vor.u32 1.1754944e-38, %v308_v1  ;;  %vm307_vm13 = vcmp.eq.f32.partialorder %v306_v6, 8.507059e+37 }
 0x2a0   :  { %v223_v53 = vadd.f32 %v2002_v45, %v222_v51 }
 0x2a1   :  { %v2004_v54 = vpop.eup %2003 }
 0x2a2   :  { %v2006_v56 = vpop.eup %2005  ;;  %v376_v57 = vmul.f32 %v2004_v54, %v374_v47  ;;  %v227_v58 = vsel %vm226_vm4, %v2002_v45, %v223_v53  ;;  %vm381_vm6 = vweird.f32 %v2004_v54 }
 0x2a3   :  { %v298_v59 = vmul.f32 %v2006_v56, %v296_v48  ;;  %v232_v60 = vsel %vm229_vm5, %v231_v55, %v227_v58  ;;  %vm303_vm7 = vweird.f32 %v2006_v56  ;;  %vm382_vm10 = vmor %vm380_vm8, %vm381_vm6  ;;  %v669_v20 = vpop.permute.xlu2 %668 }
 0x2a4   :  { %v377_v61 = vsub.f32 1.0, %v376_v57  ;;  %v233_v62 = vmul.f32 %v1996_v29, %v232_v60  ;;  %vm304_vm11 = vmor %vm302_vm9, %vm303_vm7 }
 0x2a5   :  { %v299_v63 = vsub.f32 1.0, %v298_v59 }
 0x2a6   :  { %v378_v2 = vmul.f32 %v2004_v54, %v377_v61  ;;  %1906 = vmatmul.msk.f32.vlgmr.msra.gmra.mxu2 %vm185_vm1, %v233_v62 }
 0x2a7   :  { %v300_v5 = vmul.f32 %v2006_v56, %v299_v63  ;;  %1913 = vmatpush.xpose.msk.msra.mxu2 %vm185_vm1, %v419_v41 }
 0x2a8   :  { %v379_v9 = vadd.f32 %v2004_v54, %v378_v2 }
 0x2a9   :  { %v301_v10 = vadd.f32 %v2006_v56, %v300_v5 }
 0x2aa   :  { %v383_v13 = vsel %vm382_vm10, %v2004_v54, %v379_v9 }
 0x2ab   :  { %v305_v14 = vsel %vm304_vm11, %v2006_v56, %v301_v10  ;;  %v388_v15 = vsel %vm385_vm12, %v387_v11, %v383_v13  ;;  %v745_v24 = vpop.permute.xlu2 %744 }
 0x2ac   :  { %v310_v16 = vsel %vm307_vm13, %v309_v12, %v305_v14  ;;  %v389_v17 = vmul.f32 %v2439_v33, %v388_v15 }
 0x2ad   :  { %v311_v19 = vmul.f32 %v2441_v34, %v310_v16  ;;  %v667_v23 = vpop.permute.xlu0 %666 }
 0x2ae   :  { %1912 = vmatmul.msk.f32.vlgmr.msra.gmra.mxu3 %vm185_vm1, %v389_v17 }
 0x2af   :  { %1909 = vmatmul.msk.f32.vlgmr.msrb.gmra.mxu2 %vm185_vm1, %v311_v19  ;;  %1922 = vmatpush.xpose.msk.msra.mxu3 %vm185_vm1, %v669_v20 }
 0x2b0   :  { %1919 = vmatpush.xpose.msk.msrb.mxu2 %vm185_vm1, %v591_v18 }
 0x2b6   :  { %1917 = vmatmul.msk.f32.vlgmr.msrb.gmra.mxu3 %vm185_vm1, %v2422_v21 }
 0x2b7   :  { %1914 = vmatmul.msk.f32.vlgmr.msra.gmra.mxu2 %vm185_vm1, %v2454_v42 }
 0x2b8   :  { %1925 = vmatpush.xpose.msk.msra.mxu2 %vm185_vm1, %v747_v22 }
 0x2be   :  { %1923 = vmatmul.msk.f32.vlgmr.msra.gmra.mxu3 %vm185_vm1, %v667_v23 }
 0x2bf   :  { %1920 = vmatmul.msk.f32.vlgmr.msrb.gmra.mxu2 %vm185_vm1, %v2456_v43 }
 0x2c7   :  { %1926 = vmatmul.msk.f32.vlgmr.msra.gmra.mxu2 %vm185_vm1, %v745_v24 }
 0x329   :  { %v2475_v25 = vpop.f32.mrf.mxu2 }
 0x331   :  { %v2477_v26 = vpop.f32.mrf.mxu3 }
 0x332   :  { %v335_v27 = vpop.f32.mrf.mxu2 }
 0x339   :  { %v535_v28 = vpop.f32.mrf.mxu3 }
 0x33a   :  { %v441_v29 = vpop.f32.mrf.mxu2  ;;  %v538_v30 = vsel %vm185_vm1, %v535_v28, -inf }
 0x33b   :  { %v444_v31 = vsel %vm185_vm1, %v441_v29, -inf  ;;  %539 = vmax.xlane.f32.xlu0 %v538_v30 }
 0x33c   :  { %445 = vmax.xlane.f32.xlu1 %v444_v31 }
 0x341   :  { %v691_v32 = vpop.f32.mrf.mxu3 }
 0x342   :  { %v613_v33 = vpop.f32.mrf.mxu2  ;;  %v694_v34 = vsel %vm185_vm1, %v691_v32, -inf }
 0x343   :  { %v616_v35 = vsel %vm185_vm1, %v613_v33, -inf }
 0x344   :  { %617 = vmax.xlane.f32.xlu2 %v616_v35  ;;  %695 = vmax.xlane.f32.xlu1 %v694_v34 }
 0x34a   :  { %v769_v36 = vpop.f32.mrf.mxu2 }
 0x34b   :  { %v772_v37 = vsel %vm185_vm1, %v769_v36, -inf }
 0x34c   :  { %773 = vmax.xlane.f32.xlu0 %v772_v37 }
 0x35c   :  { %562 = vrot.lane.b32.xlu2 %v2422_v21, %s2240_s24  ;;  %s2245_s24 = smov 24  }
 0x360   :  { %468 = vrot.lane.b32.xlu0 %v2392_v7, %s2243_s10 }
 0x3ae   :  { %v540_v38 = vpop.xlane.xlu0 %539 }
 0x3af   :  { %v446_v39 = vpop.xlane.xlu1 %445  ;;  %v541_v40 = vsub.f32 %v535_v28, %v540_v38 }
 0x3b0   :  { %v447_v41 = vsub.f32 %v441_v29, %v446_v39 }
 0x3b1   :  { %v542_v42 = vmul.f32 1.442695, %v541_v40 }
 0x3b2   :  { %v448_v43 = vmul.f32 1.442695, %v447_v41 }
 0x3b3   :  { %2007 = vpow2.f32 %v542_v42 }
 0x3b4   :  { %2009 = vpow2.f32 %v448_v43 }
 0x3b7   :  { %v618_v44 = vpop.xlane.xlu2 %617  ;;  %v696_v45 = vpop.xlane.xlu1 %695 }
 0x3b8   :  { %v619_v46 = vsub.f32 %v613_v33, %v618_v44  ;;  %v697_v47 = vsub.f32 %v691_v32, %v696_v45 }
 0x3b9   :  { %v2488_v48 = vpop.eup %2007 }
 0x3ba   :  { %v2490_v49 = vpop.eup %2009  ;;  %v620_v50 = vmul.f32 1.442695, %v619_v46  ;;  %v698_v51 = vmul.f32 1.442695, %v697_v47  ;;  %v544_v7 = vsel %vm185_vm1, %v2488_v48, 0.0 }
 0x3bb   :  { %v450_v52 = vsel %vm185_vm1, %v2490_v49, 0.0  ;;  %545 = vadd.xlane.f32.xlu1 %v544_v7 }
 0x3bc   :  { %2011 = vpow2.f32 %v620_v50  ;;  %451 = vadd.xlane.f32.xlu2 %v450_v52 }
 0x3bd   :  { %2013 = vpow2.f32 %v698_v51 }
 0x3bf   :  { %v563_v53 = vpop.permute.xlu2 %562  ;;  %v774_v54 = vpop.xlane.xlu0 %773 }
 0x3c0   :  { %v775_v55 = vsub.f32 %v769_v36, %v774_v54  ;;  %583 = vmatpush.msra.mxu0 %v563_v53 }
 0x3c2   :  { %v2496_v56 = vpop.eup %2011  ;;  %v776_v57 = vmul.f32 1.442695, %v775_v55 }
 0x3c3   :  { %v2498_v58 = vpop.eup %2013  ;;  %v622_v59 = vsel %vm185_vm1, %v2496_v56, 0.0 }
 0x3c4   :  { %2015 = vpow2.f32 %v776_v57  ;;  %623 = vadd.xlane.f32.xlu0 %v622_v59  ;;  %v700_v60 = vsel %vm185_vm1, %v2498_v58, 0.0 }
 0x3c5   :  { %701 = vadd.xlane.f32.xlu2 %v700_v60 }
 0x3ca   :  { %v2504_v61 = vpop.eup %2015 }
 0x3cb   :  { %v778_v62 = vsel %vm185_vm1, %v2504_v61, 0.0 }
 0x3cc   :  { %779 = vadd.xlane.f32.xlu1 %v778_v62 }
 0x3d2   :  { %v469_v63 = vpop.permute.xlu0 %468 }
 0x3d3   :  { %489 = vmatpush.msra.mxu1 %v469_v63 }
 0x3d8   :  { %718 = vrot.lane.b32.xlu0 %v2422_v21, %s2242_s28 }
 0x3dd   :  { %796 = vrot.lane.b32.xlu2 %v2422_v21, %s2243_s10 }
 0x3e0   :  { %495 = vrot.lane.b32.xlu0 %v335_v27, %s2228_s2 }
 0x3e5   :  { %640 = vrot.lane.b32.xlu1 %v2422_v21, %s2238_s21 }
 0x3ed   :  { %499 = vrot.lane.b32.xlu1 %v2477_v26, %s2244_s29 }
 0x42e   :  { %v546_v0 = vpop.xlane.xlu1 %545 }
 0x42f   :  { %v452_v1 = vpop.xlane.xlu2 %451  ;;  %2017 = vrcp.f32 %v546_v0  ;;  %v558_v21 = vand.u32 2147483648, %v546_v0  ;;  %v556_v15 = vand.u32 2147483647, %v546_v0  ;;  %vm552_vm2 = vweird.f32 %v546_v0 }
 0x430   :  { %2019 = vrcp.f32 %v452_v1  ;;  %v464_v13 = vand.u32 2147483648, %v452_v1  ;;  %v462_v17 = vand.u32 2147483647, %v452_v1  ;;  %vm458_vm3 = vweird.f32 %v452_v1 }
 0x431   :  { %v559_v20 = vor.u32 1.1754944e-38, %v558_v21  ;;  %vm557_vm6 = vcmp.eq.f32.partialorder %v556_v15, 8.507059e+37  ;;  %v837_v21 = vld [vmem:[%s2839_s4] sm:$0xff] }
 0x432   :  { %v465_v23 = vor.u32 1.1754944e-38, %v464_v13  ;;  %vm463_vm7 = vcmp.eq.f32.partialorder %v462_v17, 8.507059e+37 }
 0x435   :  { %v2018_v2 = vpop.eup %2017 }
 0x436   :  { %v2020_v3 = vpop.eup %2019  ;;  %v548_v5 = vmul.f32 %v2018_v2, %v546_v0  ;;  %vm553_vm14 = vweird.f32 %v2018_v2 }
 0x437   :  { %v454_v6 = vmul.f32 %v2020_v3, %v452_v1  ;;  %v2517_v9 = vpop.xlane.xlu0 %623  ;;  %vm459_vm15 = vweird.f32 %v2020_v3  ;;  %vm554_vm4 = vmor %vm552_vm2, %vm553_vm14 }
 0x438   :  { %v549_v10 = vsub.f32 1.0, %v548_v5  ;;  %v702_v11 = vpop.xlane.xlu2 %701  ;;  %2021 = vrcp.f32 %v2517_v9  ;;  %vm460_vm5 = vmor %vm458_vm3, %vm459_vm15  ;;  %v636_v51 = vand.u32 2147483648, %v2517_v9  ;;  %vm630_vm13 = vweird.f32 %v2517_v9  ;;  %v840_v5 = vld [vmem:[%s2839_s4 + $0x18] sm:$0xff] }
 0x439   :  { %v455_v12 = vsub.f32 1.0, %v454_v6  ;;  %2023 = vrcp.f32 %v702_v11  ;;  %v714_v36 = vand.u32 2147483648, %v702_v11  ;;  %v712_v38 = vand.u32 2147483647, %v702_v11  ;;  %863 = vmatpush.msrb.mxu3 %v840_v5 }
 0x43a   :  { %v550_v14 = vmul.f32 %v2018_v2, %v549_v10  ;;  %vm708_vm9 = vweird.f32 %v702_v11  ;;  %v634_v7 = vand.u32 2147483647, %v2517_v9  ;;  %v637_v54 = vor.u32 1.1754944e-38, %v636_v51  ;;  %v838_v10 = vld [vmem:[%s2839_s4 + $0x8] sm:$0xff] }
 0x43b   :  { %v456_v16 = vmul.f32 %v2020_v3, %v455_v12  ;;  %v715_v42 = vor.u32 1.1754944e-38, %v714_v36  ;;  %vm713_vm11 = vcmp.eq.f32.partialorder %v712_v38, 8.507059e+37 }
 0x43c   :  { %v551_v18 = vadd.f32 %v2018_v2, %v550_v14  ;;  %vm635_vm15 = vcmp.eq.f32.partialorder %v634_v7, 8.507059e+37 }
 0x43d   :  { %v457_v19 = vadd.f32 %v2020_v3, %v456_v16 }
 0x43e   :  { %v2022_v22 = vpop.eup %2021  ;;  %v555_v24 = vsel %vm554_vm4, %v2018_v2, %v551_v18 }
 0x43f   :  { %v2024_v26 = vpop.eup %2023  ;;  %v461_v27 = vsel %vm460_vm5, %v2020_v3, %v457_v19  ;;  %v560_v28 = vsel %vm557_vm6, %v559_v20, %v555_v24  ;;  %v780_v29 = vpop.xlane.xlu1 %779  ;;  %v626_v32 = vmul.f32 %v2022_v22, %v2517_v9  ;;  %vm631_vm12 = vweird.f32 %v2022_v22 }
 0x440   :  { %v466_v30 = vsel %vm463_vm7, %v465_v23, %v461_v27  ;;  %v704_v31 = vmul.f32 %v2024_v26, %v702_v11  ;;  %2025 = vrcp.f32 %v780_v29  ;;  %v561_v35 = vmul.f32 %v2488_v48, %v560_v28  ;;  %vm632_vm14 = vmor %vm630_vm13, %vm631_vm12  ;;  %v797_v63 = vpop.permute.xlu2 %796 }
 0x441   :  { %v467_v34 = vmul.f32 %v2490_v49, %v466_v30  ;;  %vm709_vm8 = vweird.f32 %v2024_v26  ;;  %v627_v39 = vsub.f32 1.0, %v626_v32  ;;  %vm786_vm3 = vweird.f32 %v780_v29 }
 0x442   :  { %v705_v33 = vsub.f32 1.0, %v704_v31  ;;  %1918 = vmatmul.msk.f32.vlgmr.msra.gmra.mxu0 %vm185_vm1, %v561_v35  ;;  %vm710_vm10 = vmor %vm708_vm9, %vm709_vm8  ;;  %v790_v59 = vand.u32 2147483647, %v780_v29  ;;  %vm507_vm6 = vcmask 130048   ;;  %vm509_vm7 = vcmask 195584  }
 0x443   :  { %1915 = vmatmul.msk.f32.vlgmr.msra.gmra.mxu1 %vm185_vm1, %v467_v34  ;;  %v628_v45 = vmul.f32 %v2022_v22, %v627_v39  ;;  %v2246_v35 = vmov 32.0  }
 0x444   :  { %v706_v37 = vmul.f32 %v2024_v26, %v705_v33  ;;  %vm791_vm5 = vcmp.eq.f32.partialorder %v790_v59, 8.507059e+37  ;;  %2027 = vrcp.f32 %v2246_v35 }
 0x445   :  { %v629_v49 = vadd.f32 %v2022_v22, %v628_v45  ;;  %v977_v45 = vld [vmem:[#allocation7 + $0x18] sm:$0xff] }
 0x446   :  { %v2026_v40 = vpop.eup %2025  ;;  %v707_v41 = vadd.f32 %v2024_v26, %v706_v37  ;;  %1000 = vmatpush.msrb.mxu2 %v977_v45 }
 0x447   :  { %v782_v46 = vmul.f32 %v2026_v40, %v780_v29  ;;  %v633_v52 = vsel %vm632_vm14, %v2022_v22, %v629_v49  ;;  %vm787_vm2 = vweird.f32 %v2026_v40  ;;  %v140_v49 = vld [vmem:[#allocation5] sm:$0xff] }
 0x448   :  { %v711_v43 = vsel %vm710_vm10, %v2024_v26, %v707_v41  ;;  %v638_v55 = vsel %vm635_vm15, %v637_v54, %v633_v52  ;;  %vm788_vm4 = vmor %vm786_vm3, %vm787_vm2  ;;  %v940_v54 = vld [vmem:[%s2841_s6 + $0x18] sm:$0xff] }
 0x449   :  { %v716_v44 = vsel %vm713_vm11, %v715_v42, %v711_v43  ;;  %v783_v50 = vsub.f32 1.0, %v782_v46  ;;  %v639_v62 = vmul.f32 %v2496_v56, %v638_v55  ;;  %v839_v56 = vld [vmem:[%s2839_s4 + $0x10] sm:$0xff] }
 0x44a   :  { %v719_v47 = vpop.permute.xlu0 %718  ;;  %v717_v48 = vmul.f32 %v2498_v58, %v716_v44  ;;  %v792_v58 = vand.u32 2147483648, %v780_v29  ;;  %864 = vmatpush.msrb.mxu3 %v839_v56  ;;  %v2028_v36 = vpop.eup %2027  ;;  %v976_v46 = vld [vmem:[#allocation7 + $0x10] sm:$0xff]  ;;  %v2589_v56 = vld [vmem:[%s2851_s16] ss:$0 sm:$0xff] }
 0x44b   :  { %739 = vmatpush.msrb.mxu0 %v719_v47  ;;  %v784_v53 = vmul.f32 %v2026_v40, %v783_v50  ;;  %v883_v37 = vmul.f32 32.0, %v2028_v36  ;;  %vm887_vm8 = vweird.f32 %v2028_v36  ;;  %v975_v47 = vld [vmem:[#allocation7 + $0x8] sm:$0xff]  ;;  %1001 = vmatpush.msrb.mxu2 %v976_v46  ;;  %v939_v55 = vld [vmem:[%s2841_s6 + $0x10] sm:$0xff] }
 0x44c   :  { %1924 = vmatmul.msk.f32.vlgmr.msrb.gmra.mxu0 %vm185_vm1, %v717_v48  ;;  %v793_v1 = vor.u32 1.1754944e-38, %v792_v58  ;;  %865 = vmatpush.msrb.mxu3 %v838_v10  ;;  %v974_v48 = vld [vmem:[#allocation7] sm:$0xff] }
 0x44d   :  { %v785_v57 = vadd.f32 %v2026_v40, %v784_v53  ;;  %v884_v38 = vsub.f32 1.0, %v883_v37  ;;  %1002 = vmatpush.msrb.mxu2 %v975_v47  ;;  %963 = vmatpush.msra.mxu0 %v940_v54  ;;  %v937_v58 = vld [vmem:[%s2841_s6] sm:$0xff] }
 0x44e   :  { %866 = vmatpush.msrb.mxu3 %v837_v21  ;;  %v2594_v10 = vld [vmem:[%s2852_s17] ss:$0 sm:$0xff]  ;;  %s1887_s17 = sshll.u32 %s2853_s18, 4  ;;  %s1888_s17 = int_to_ptr.hbm [resolvable:$true] %s1887_s17 }
 0x44f   :  { %v789_v0 = vsel %vm788_vm4, %v2026_v40, %v785_v57  ;;  %v885_v39 = vmul.f32 %v2028_v36, %v884_v38  ;;  %1003 = vmatpush.msrb.mxu2 %v974_v48  ;;  %964 = vmatpush.msra.mxu0 %v939_v55  ;;  %v938_v57 = vld [vmem:[%s2841_s6 + $0x8] sm:$0xff]  ;;  %v1990_v21 = vld [vmem:[%s2844_s9] ss:$0 sm:$0xff] }
 0x450   :  { %v794_v2 = vsel %vm791_vm5, %v793_v1, %v789_v0  ;;  %1932 = vmatmul.msk.f32.vlgmr.msrb.gmra.mxu2 %vm152_vm0, %v140_v49 }
 0x451   :  { %v795_v3 = vmul.f32 %v2504_v61, %v794_v2  ;;  %v886_v40 = vadd.f32 %v2028_v36, %v885_v39  ;;  %965 = vmatpush.msra.mxu0 %v938_v57 }
 0x452   :  { %v496_v13 = vpop.permute.xlu0 %495 }
 0x453   :  { %v506_v15 = vsel %vm185_vm1, %v2475_v25, %v496_v13  ;;  %v1987_v25 = vld [vmem:[%s2840_s5] ss:$0 sm:$0xff]  ;;  %v2566_v41 = vsel %vm887_vm8, %v2028_v36, %v886_v40  ;;  %966 = vmatpush.msra.mxu0 %v937_v58 }
 0x457   :  { %v641_v60 = vpop.permute.xlu1 %640 }
 0x458   :  { %661 = vmatpush.msrb.mxu1 %v641_v60 }
 0x459   :  { %1921 = vmatmul.msk.f32.vlgmr.msrb.gmra.mxu1 %vm185_vm1, %v639_v62 }
 0x45a   :  { %817 = vmatpush.msra.mxu1 %v797_v63 }
 0x45f   :  { %v500_v14 = vpop.permute.xlu1 %499 }
 0x460   :  { %v508_v16 = vsel %vm507_vm6, %v506_v15, %v500_v14 }
 0x461   :  { %1927 = vmatmul.msk.f32.vlgmr.msra.gmra.mxu1 %vm185_vm1, %v795_v3 }
 0x4bf   :  { %v585_v9 = vpop.f32.mrf.mxu0 }
 0x4c0   :  { %v491_v6 = vpop.f32.mrf.mxu1 }
 0x4c1   :  { %503 = vrot.lane.b32.xlu2 %v491_v6, %s2245_s24 }
 0x4c9   :  { %v741_v61 = vpop.f32.mrf.mxu0 }
 0x4ca   :  { %827 = vrot.lane.b32.xlu1 %v741_v61, %s2244_s29 }
 0x4d3   :  { %v1005_v13 = vpop.f32.mrf.mxu2 }
 0x4d4   :  { %v2606_v14 = vadd.f32 %v1990_v21, %v1005_v13 }
 0x4d6   :  { %v663_v11 = vpop.f32.mrf.mxu1  ;;  %1934 = vmatpush.xpose.msk.msrb.mxu1 %vm185_vm1, %v2606_v14 }
 0x4d7   :  { %823 = vrot.lane.b32.xlu0 %v663_v11, %s2228_s2 }
 0x4de   :  { %v819_v12 = vpop.f32.mrf.mxu1 }
 0x4df   :  { %831 = vrot.lane.b32.xlu2 %v819_v12, %s2245_s24  ;;  %v141_v12 = vld [vmem:[#allocation5 + $0x8] sm:$0xff] }
 0x4e0   :  { %1933 = vmatmul.msk.f32.gmra.mxu2 %vm152_vm0, %v141_v12 }
 0x51b   :  { %v504_v17 = vpop.permute.xlu2 %503 }
 0x51c   :  { %v510_v18 = vsel %vm509_vm7, %v508_v16, %v504_v17 }
 0x51d   :  { %1928 = vmatmul.msk.f32.vlgmr.msrb.gmra.mxu3 %vm152_vm0, %v510_v18 }
 0x539   :  { %v832_v23 = vpop.permute.xlu2 %831 }
 0x53c   :  { %v828_v20 = vpop.permute.xlu1 %827 }
 0x549   :  { %v824_v19 = vpop.permute.xlu0 %823 }
 0x54a   :  { %v834_v22 = vsel %vm185_vm1, %v585_v9, %v824_v19 }
 0x54b   :  { %v835_v24 = vsel %vm507_vm6, %v834_v22, %v828_v20 }
 0x54c   :  { %v836_v26 = vsel %vm509_vm7, %v835_v24, %v832_v23 }
 0x54d   :  { %1929 = vmatmul.msk.f32.gmra.mxu3 %vm152_vm0, %v836_v26 }
 0x5a0   :  { %v868_v27 = vpop.f32.mrf.mxu3 }
 0x5a1   :  { %v869_v28 = vadd.f32 %v1987_v25, %v868_v27 }
 0x5a3   :  { %v874_v29 = vadd.f32 %v869_v28, %v2385_v4 }
 0x5a5   :  { %v876_v30 = vsel %vm152_vm0, %v874_v29, 0.0 }
 0x5a6   :  { %877 = vadd.xlane.f32.xlu0 %v876_v30 }
 0x5d0   :  { %v871_v31 = vpop.f32.mrf.mxu3 }
 0x5d1   :  { %v872_v32 = vadd.f32 %v1987_v25, %v871_v31 }
 0x5d3   :  { %v875_v33 = vadd.f32 %v872_v32, %v2404_v8  ;;  %v1008_v32 = vpop.f32.mrf.mxu2 }
 0x5d5   :  { %v879_v34 = vsel %vm152_vm0, %v875_v33, 0.0 }
 0x5d6   :  { %880 = vadd.xlane.f32.xlu1 %v879_v34 }
 0x5ef   :  { %1089 = vrot.lane.b32.xlu1 %v2606_v14, %s2234_s25 }
 0x5f7   :  { %1245 = vrot.lane.b32.xlu1 %v2606_v14, %s2241_s27 }
 0x619   :  { %v878_v4 = vpop.xlane.xlu0 %877 }
 0x61a   :  { %v889_v42 = vmul.f32 %v2566_v41, %v878_v4 }
 0x61c   :  { %v891_v43 = vsub.f32 %v874_v29, %v889_v42  ;;  %v1991_v29 = vld [vmem:[%s2842_s7] ss:$0 sm:$0xff] }
 0x61e   :  { %v893_v44 = vmul.f32 %v891_v43, %v891_v43 }
 0x620   :  { %v895_v8 = vsel %vm152_vm0, %v893_v44, 0.0 }
 0x621   :  { %896 = vadd.xlane.f32.xlu2 %v895_v8 }
 0x649   :  { %v881_v50 = vpop.xlane.xlu1 %880 }
 0x64a   :  { %v890_v51 = vmul.f32 %v2566_v41, %v881_v50 }
 0x64c   :  { %v892_v7 = vsub.f32 %v875_v33, %v890_v51  ;;  %v2629_v33 = vadd.f32 %v1990_v21, %v1008_v32 }
 0x64e   :  { %v894_v52 = vmul.f32 %v892_v7, %v892_v7  ;;  %1414 = vrot.lane.b32.xlu1 %v2629_v33, %s2234_s25 }
 0x650   :  { %v898_v53 = vsel %vm152_vm0, %v894_v52, 0.0 }
 0x651   :  { %899 = vadd.xlane.f32.xlu0 %v898_v53 }
 0x656   :  { %1570 = vrot.lane.b32.xlu1 %v2629_v33, %s2241_s27 }
 0x661   :  { %v1090_v35 = vpop.permute.xlu1 %1089 }
 0x662   :  { %1937 = vmatpush.xpose.msk.msra.mxu3 %vm185_vm1, %v1090_v35 }
 0x665   :  { %1167 = vrot.lane.b32.xlu0 %v2606_v14, %s2233_s23 }
 0x669   :  { %v1246_v38 = vpop.permute.xlu1 %1245 }
 0x66a   :  { %1943 = vmatpush.xpose.msk.msrb.mxu3 %vm185_vm1, %v1246_v38 }
 0x694   :  { %v897_v59 = vpop.xlane.xlu2 %896 }
 0x695   :  { %v901_v60 = vmul.f32 %v897_v59, %v2566_v41 }
 0x697   :  { %v903_v62 = vadd.f32 1e-05, %v901_v60 }
 0x699   :  { %2029 = vrsqrt.f32 %v903_v62  ;;  %vm911_vm10 = vweird.f32 %v903_v62 }
 0x69f   :  { %v2030_v63 = vpop.eup %2029 }
 0x6a0   :  { %v906_v0 = vmul.f32 %v2030_v63, %v903_v62  ;;  %vm912_vm9 = vweird.f32 %v2030_v63 }
 0x6a1   :  { %vm913_vm11 = vmor %vm911_vm10, %vm912_vm9 }
 0x6a2   :  { %v907_v1 = vmul.f32 %v2030_v63, %v906_v0 }
 0x6a4   :  { %v908_v2 = vmul.f32 0.5, %v907_v1 }
 0x6a6   :  { %v909_v3 = vsub.f32 1.5, %v908_v2 }
 0x6a8   :  { %v910_v5 = vmul.f32 %v2030_v63, %v909_v3 }
 0x6aa   :  { %v914_v6 = vsel %vm913_vm11, %v2030_v63, %v910_v5 }
 0x6ab   :  { %v925_v9 = vmul.f32 %v914_v6, %v891_v43 }
 0x6ad   :  { %v930_v61 = vmul.f32 %v2589_v56, %v925_v9 }
 0x6af   :  { %v2598_v11 = vadd.f32 %v2594_v10, %v930_v61 }
 0x6b1   :  { %1930 = vmatmul.msk.f32.vlgmr.msra.gmra.mxu0 %vm152_vm0, %v2598_v11 }
 0x6c0   :  { %v1415_v43 = vpop.permute.xlu1 %1414 }
 0x6c4   :  { %v900_v15 = vpop.xlane.xlu0 %899 }
 0x6c5   :  { %v902_v16 = vmul.f32 %v900_v15, %v2566_v41 }
 0x6c7   :  { %v904_v17 = vadd.f32 1e-05, %v902_v16 }
 0x6c8   :  { %v1571_v45 = vpop.permute.xlu1 %1570 }
 0x6c9   :  { %2031 = vrsqrt.f32 %v904_v17  ;;  %vm921_vm13 = vweird.f32 %v904_v17 }
 0x6cf   :  { %v2032_v18 = vpop.eup %2031 }
 0x6d0   :  { %v916_v19 = vmul.f32 %v2032_v18, %v904_v17  ;;  %vm922_vm12 = vweird.f32 %v2032_v18 }
 0x6d1   :  { %vm923_vm14 = vmor %vm921_vm13, %vm922_vm12 }
 0x6d2   :  { %v917_v20 = vmul.f32 %v2032_v18, %v916_v19 }
 0x6d4   :  { %v918_v22 = vmul.f32 0.5, %v917_v20 }
 0x6d6   :  { %v919_v23 = vsub.f32 1.5, %v918_v22 }
 0x6d7   :  { %v1168_v34 = vpop.permute.xlu0 %1167 }
 0x6d8   :  { %v920_v24 = vmul.f32 %v2032_v18, %v919_v23  ;;  %1940 = vmatpush.xpose.msk.msra.mxu2 %vm185_vm1, %v1168_v34 }
 0x6da   :  { %v924_v26 = vsel %vm923_vm14, %v2032_v18, %v920_v24 }
 0x6db   :  { %v926_v25 = vmul.f32 %v924_v26, %v892_v7 }
 0x6dc   :  { %1946 = vmatpush.xpose.msk.msrb.mxu2 %vm185_vm1, %v2629_v33 }
 0x6dd   :  { %v931_v27 = vmul.f32 %v2589_v56, %v926_v25 }
 0x6df   :  { %v2619_v28 = vadd.f32 %v2594_v10, %v931_v27 }
 0x6e1   :  { %1931 = vmatmul.msk.f32.gmra.mxu0 %vm152_vm0, %v2619_v28 }
 0x72e   :  { %v968_v30 = vpop.f32.mrf.mxu0 }
 0x72f   :  { %v969_v31 = vadd.f32 %v1991_v29, %v968_v30 }
 0x731   :  { %1165 = vrot.lane.b32.xlu0 %v969_v31, %s2233_s23  ;;  %1087 = vrot.lane.b32.xlu2 %v969_v31, %s2234_s25 }
 0x732   :  { %1935 = vmatmul.msk.f32.vlgmr.msrb.gmra.mxu1 %vm185_vm1, %v969_v31 }
 0x739   :  { %1243 = vrot.lane.b32.xlu2 %v969_v31, %s2241_s27 }
 0x741   :  { %1492 = vrot.lane.b32.xlu2 %v2629_v33, %s2233_s23 }
 0x75e   :  { %v971_v36 = vpop.f32.mrf.mxu0 }
 0x75f   :  { %v972_v37 = vadd.f32 %v1991_v29, %v971_v36 }
 0x761   :  { %1568 = vrot.lane.b32.xlu2 %v972_v37, %s2241_s27  ;;  %1412 = vrot.lane.b32.xlu0 %v972_v37, %s2234_s25 }
 0x769   :  { %1490 = vrot.lane.b32.xlu0 %v972_v37, %s2233_s23 }
 0x78b   :  { %v1088_v39 = vpop.permute.xlu2 %1087 }
 0x78c   :  { %1938 = vmatmul.msk.f32.vlgmr.msra.gmra.mxu3 %vm185_vm1, %v1088_v39 }
 0x78d   :  { %1949 = vmatpush.xpose.msk.msra.mxu3 %vm185_vm1, %v1415_v43 }
 0x793   :  { %v1244_v40 = vpop.permute.xlu2 %1243 }
 0x794   :  { %1944 = vmatmul.msk.f32.vlgmr.msrb.gmra.mxu3 %vm185_vm1, %v1244_v40 }
 0x795   :  { %1955 = vmatpush.xpose.msk.msrb.mxu3 %vm185_vm1, %v1571_v45 }
 0x79b   :  { %v1493_v42 = vpop.permute.xlu2 %1492 }
 0x7a3   :  { %v1166_v4 = vpop.permute.xlu0 %1165 }
 0x7a4   :  { %1941 = vmatmul.msk.f32.vlgmr.msra.gmra.mxu2 %vm185_vm1, %v1166_v4 }
 0x7a5   :  { %1952 = vmatpush.xpose.msk.msra.mxu2 %vm185_vm1, %v1493_v42 }
 0x7ac   :  { %1947 = vmatmul.msk.f32.vlgmr.msrb.gmra.mxu2 %vm185_vm1, %v972_v37 }
 0x7af   :  { %v1034_v44 = vpop.f32.mrf.mxu1 }
 0x7b0   :  { %v1037_v8 = vsel %vm185_vm1, %v1034_v44, -inf }
 0x7b1   :  { %1038 = vmax.xlane.f32.xlu1 %v1037_v8 }
 0x7bb   :  { %v1569_v47 = vpop.permute.xlu2 %1568 }
 0x7d3   :  { %v1413_v46 = vpop.permute.xlu0 %1412 }
 0x7d4   :  { %1950 = vmatmul.msk.f32.vlgmr.msra.gmra.mxu3 %vm185_vm1, %v1413_v46 }
 0x7db   :  { %v1491_v48 = vpop.permute.xlu0 %1490 }
 0x7dc   :  { %1953 = vmatmul.msk.f32.vlgmr.msra.gmra.mxu2 %vm185_vm1, %v1491_v48  ;;  %1956 = vmatmul.msk.f32.vlgmr.msrb.gmra.mxu3 %vm185_vm1, %v1569_v47 }
 0x80f   :  { %v1112_v49 = vpop.f32.mrf.mxu3 }
 0x810   :  { %v1115_v50 = vsel %vm185_vm1, %v1112_v49, -inf }
 0x811   :  { %1116 = vmax.xlane.f32.xlu0 %v1115_v50 }
 0x817   :  { %v1268_v51 = vpop.f32.mrf.mxu3 }
 0x818   :  { %v1271_v7 = vsel %vm185_vm1, %v1268_v51, -inf }
 0x819   :  { %1272 = vmax.xlane.f32.xlu1 %v1271_v7 }
 0x824   :  { %v1039_v52 = vpop.xlane.xlu1 %1038 }
 0x825   :  { %v1040_v53 = vsub.f32 %v1034_v44, %v1039_v52 }
 0x827   :  { %v1041_v54 = vmul.f32 1.442695, %v1040_v53  ;;  %v1190_v55 = vpop.f32.mrf.mxu2 }
 0x828   :  { %v1193_v57 = vsel %vm185_vm1, %v1190_v55, -inf }
 0x829   :  { %2033 = vpow2.f32 %v1041_v54  ;;  %1194 = vmax.xlane.f32.xlu2 %v1193_v57 }
 0x82f   :  { %v2660_v58 = vpop.eup %2033  ;;  %v1359_v59 = vpop.f32.mrf.mxu2 }
 0x830   :  { %v1362_v60 = vsel %vm185_vm1, %v1359_v59, -inf  ;;  %v1043_v62 = vsel %vm185_vm1, %v2660_v58, 0.0 }
 0x831   :  { %1363 = vmax.xlane.f32.xlu0 %v1362_v60  ;;  %1044 = vadd.xlane.f32.xlu2 %v1043_v62 }
 0x857   :  { %v1437_v63 = vpop.f32.mrf.mxu3 }
 0x858   :  { %v1440_v0 = vsel %vm185_vm1, %v1437_v63, -inf }
 0x859   :  { %1441 = vmax.xlane.f32.xlu2 %v1440_v0 }
 0x85f   :  { %v2666_v1 = vpop.f32.mrf.mxu2  ;;  %v2668_v2 = vpop.f32.mrf.mxu3 }
 0x860   :  { %v1596_v3 = vsel %vm185_vm1, %v2668_v2, -inf  ;;  %v1518_v5 = vsel %vm185_vm1, %v2666_v1, -inf }
 0x861   :  { %1597 = vmax.xlane.f32.xlu0 %v1596_v3  ;;  %1519 = vmax.xlane.f32.xlu1 %v1518_v5 }
 0x871   :  { %1061 = vrot.lane.b32.xlu2 %v2606_v14, %s2235_s26 }
 0x87a   :  { %1139 = vrot.lane.b32.xlu1 %v2606_v14, %s2237_s3 }
 0x884   :  { %v1117_v61 = vpop.xlane.xlu0 %1116 }
 0x885   :  { %v1118_v21 = vsub.f32 %v1112_v49, %v1117_v61 }
 0x887   :  { %v1119_v13 = vmul.f32 1.442695, %v1118_v21 }
 0x88c   :  { %v1273_v6 = vpop.xlane.xlu1 %1272 }
 0x88d   :  { %v1274_v9 = vsub.f32 %v1268_v51, %v1273_v6 }
 0x88f   :  { %v1275_v12 = vmul.f32 1.442695, %v1274_v9 }
 0x891   :  { %2035 = vpow2.f32 %v1275_v12 }
 0x892   :  { %2037 = vpow2.f32 %v1119_v13 }
 0x897   :  { %v2678_v15 = vpop.eup %2035 }
 0x898   :  { %v1277_v16 = vsel %vm185_vm1, %v2678_v15, 0.0  ;;  %v2682_v19 = vpop.eup %2037 }
 0x899   :  { %v1121_v22 = vsel %vm185_vm1, %v2682_v19, 0.0 }
 0x89a   :  { %1278 = vadd.xlane.f32.xlu2 %v1277_v16 }
 0x89c   :  { %v1195_v17 = vpop.xlane.xlu2 %1194 }
 0x89d   :  { %v1196_v18 = vsub.f32 %v1190_v55, %v1195_v17 }
 0x89f   :  { %v1197_v20 = vmul.f32 1.442695, %v1196_v18 }
 0x8a1   :  { %2039 = vpow2.f32 %v1197_v20 }
 0x8a4   :  { %1122 = vadd.xlane.f32.xlu1 %v1121_v22  ;;  %v1364_v23 = vpop.xlane.xlu0 %1363  ;;  %v1045_v30 = vpop.xlane.xlu2 %1044 }
 0x8a5   :  { %v1365_v24 = vsub.f32 %v1359_v59, %v1364_v23  ;;  %v1057_v38 = vand.u32 2147483648, %v1045_v30  ;;  %vm1051_vm2 = vweird.f32 %v1045_v30  ;;  %v1055_v39 = vand.u32 2147483647, %v1045_v30 }
 0x8a7   :  { %v2686_v26 = vpop.eup %2039  ;;  %v1366_v25 = vmul.f32 1.442695, %v1365_v24  ;;  %v1058_v43 = vor.u32 1.1754944e-38, %v1057_v38  ;;  %vm1056_vm4 = vcmp.eq.f32.partialorder %v1055_v39, 8.507059e+37 }
 0x8a8   :  { %v1199_v27 = vsel %vm185_vm1, %v2686_v26, 0.0 }
 0x8a9   :  { %1200 = vadd.xlane.f32.xlu0 %v1199_v27  ;;  %2041 = vpow2.f32 %v1366_v25 }
 0x8aa   :  { %2043 = vrcp.f32 %v1045_v30 }
 0x8af   :  { %v2690_v29 = vpop.eup %2041 }
 0x8b0   :  { %v1368_v31 = vsel %vm185_vm1, %v2690_v29, 0.0  ;;  %v2044_v32 = vpop.eup %2043 }
 0x8b1   :  { %1369 = vadd.xlane.f32.xlu1 %v1368_v31  ;;  %v1047_v34 = vmul.f32 %v2044_v32, %v1045_v30  ;;  %vm1052_vm15 = vweird.f32 %v2044_v32 }
 0x8b2   :  { %1295 = vrot.lane.b32.xlu2 %v2606_v14, %s2239_s12  ;;  %vm1053_vm3 = vmor %vm1051_vm2, %vm1052_vm15 }
 0x8b3   :  { %v1048_v35 = vsub.f32 1.0, %v1047_v34 }
 0x8b5   :  { %v1049_v36 = vmul.f32 %v2044_v32, %v1048_v35 }
 0x8b7   :  { %v1050_v37 = vadd.f32 %v2044_v32, %v1049_v36 }
 0x8b9   :  { %v1054_v42 = vsel %vm1053_vm3, %v2044_v32, %v1050_v37 }
 0x8ba   :  { %1464 = vrot.lane.b32.xlu2 %v2629_v33, %s2237_s3  ;;  %v1059_v8 = vsel %vm1056_vm4, %v1058_v43, %v1054_v42 }
 0x8bb   :  { %v1060_v47 = vmul.f32 %v2660_v58, %v1059_v8 }
 0x8c2   :  { %1620 = vrot.lane.b32.xlu2 %v2629_v33, %s2239_s12 }
 0x8ca   :  { %1386 = vrot.lane.b32.xlu1 %v2629_v33, %s2235_s26 }
 0x8cc   :  { %v1442_v40 = vpop.xlane.xlu2 %1441 }
 0x8cd   :  { %v1443_v4 = vsub.f32 %v1437_v63, %v1442_v40 }
 0x8cf   :  { %v1444_v44 = vmul.f32 1.442695, %v1443_v4 }
 0x8d1   :  { %2045 = vpow2.f32 %v1444_v44 }
 0x8d2   :  { %1542 = vrot.lane.b32.xlu1 %v2629_v33, %s2236_s8 }
 0x8d4   :  { %v1062_v45 = vpop.permute.xlu2 %1061  ;;  %v1520_v46 = vpop.xlane.xlu1 %1519 }
 0x8d5   :  { %v1521_v48 = vsub.f32 %v2666_v1, %v1520_v46  ;;  %v1598_v49 = vpop.xlane.xlu0 %1597  ;;  %1082 = vmatpush.msra.mxu1 %v1062_v45 }
 0x8d6   :  { %1936 = vmatmul.msk.f32.vlgmr.msra.gmra.mxu1 %vm185_vm1, %v1060_v47  ;;  %v1599_v7 = vsub.f32 %v2668_v2, %v1598_v49 }
 0x8d7   :  { %v2707_v50 = vpop.eup %2045  ;;  %v1522_v51 = vmul.f32 1.442695, %v1521_v48 }
 0x8d8   :  { %v1446_v52 = vsel %vm185_vm1, %v2707_v50, 0.0  ;;  %v1600_v33 = vmul.f32 1.442695, %v1599_v7 }
 0x8d9   :  { %2047 = vpow2.f32 %v1522_v51  ;;  %1447 = vadd.xlane.f32.xlu0 %v1446_v52 }
 0x8da   :  { %2049 = vpow2.f32 %v1600_v33 }
 0x8df   :  { %v2712_v53 = vpop.eup %2047 }
 0x8e0   :  { %v1524_v54 = vsel %vm185_vm1, %v2712_v53, 0.0  ;;  %v2716_v55 = vpop.eup %2049 }
 0x8e1   :  { %1525 = vadd.xlane.f32.xlu0 %v1524_v54  ;;  %v1602_v57 = vsel %vm185_vm1, %v2716_v55, 0.0 }
 0x8e9   :  { %1603 = vadd.xlane.f32.xlu0 %v1602_v57 }
 0x8ec   :  { %v1140_v58 = vpop.permute.xlu1 %1139 }
 0x8ed   :  { %1160 = vmatpush.msrb.mxu0 %v1140_v58 }
 0x8fd   :  { %1217 = vrot.lane.b32.xlu0 %v2606_v14, %s2236_s8 }
 0x90d   :  { %v1279_v59 = vpop.xlane.xlu2 %1278 }
 0x90e   :  { %2051 = vrcp.f32 %v1279_v59  ;;  %v1291_v17 = vand.u32 2147483648, %v1279_v59  ;;  %vm1285_vm12 = vweird.f32 %v1279_v59  ;;  %v1289_v20 = vand.u32 2147483647, %v1279_v59 }
 0x910   :  { %v1292_v25 = vor.u32 1.1754944e-38, %v1291_v17  ;;  %vm1290_vm14 = vcmp.eq.f32.partialorder %v1289_v20, 8.507059e+37 }
 0x914   :  { %v2052_v63 = vpop.eup %2051 }
 0x915   :  { %v1296_v60 = vpop.permute.xlu2 %1295  ;;  %v1281_v0 = vmul.f32 %v2052_v63, %v1279_v59  ;;  %vm1286_vm10 = vweird.f32 %v2052_v63 }
 0x916   :  { %1316 = vmatpush.msra.mxu0 %v1296_v60  ;;  %vm1287_vm13 = vmor %vm1285_vm12, %vm1286_vm10 }
 0x917   :  { %v1123_v62 = vpop.xlane.xlu1 %1122  ;;  %v1282_v2 = vsub.f32 1.0, %v1281_v0 }
 0x918   :  { %2053 = vrcp.f32 %v1123_v62  ;;  %v1135_v6 = vand.u32 2147483648, %v1123_v62  ;;  %v1133_v12 = vand.u32 2147483647, %v1123_v62  ;;  %vm1129_vm8 = vweird.f32 %v1123_v62 }
 0x919   :  { %v1283_v9 = vmul.f32 %v2052_v63, %v1282_v2 }
 0x91a   :  { %v1136_v14 = vor.u32 1.1754944e-38, %v1135_v6  ;;  %vm1134_vm11 = vcmp.eq.f32.partialorder %v1133_v12, 8.507059e+37 }
 0x91b   :  { %v1284_v13 = vadd.f32 %v2052_v63, %v1283_v9 }
 0x91c   :  { %v1201_v32 = vpop.xlane.xlu0 %1200 }
 0x91d   :  { %v1465_v22 = vpop.permute.xlu2 %1464  ;;  %v1288_v24 = vsel %vm1287_vm13, %v2052_v63, %v1284_v13  ;;  %v1213_v59 = vand.u32 2147483648, %v1201_v32 }
 0x91e   :  { %v2054_v1 = vpop.eup %2053  ;;  %v1293_v27 = vsel %vm1290_vm14, %v1292_v25, %v1288_v24 }
 0x91f   :  { %v1125_v3 = vmul.f32 %v2054_v1, %v1123_v62  ;;  %vm1130_vm5 = vweird.f32 %v2054_v1  ;;  %v1294_v30 = vmul.f32 %v2678_v15, %v1293_v27  ;;  %v1211_v62 = vand.u32 2147483647, %v1201_v32 }
 0x920   :  { %vm1131_vm9 = vmor %vm1129_vm8, %vm1130_vm5  ;;  %vm1207_vm8 = vweird.f32 %v1201_v32  ;;  %v1214_v6 = vor.u32 1.1754944e-38, %v1213_v59 }
 0x921   :  { %v1126_v5 = vsub.f32 1.0, %v1125_v3  ;;  %vm1212_vm12 = vcmp.eq.f32.partialorder %v1211_v62, 8.507059e+37 }
 0x923   :  { %v1127_v61 = vmul.f32 %v2054_v1, %v1126_v5 }
 0x924   :  { %v2728_v37 = vpop.xlane.xlu1 %1369 }
 0x925   :  { %v1128_v21 = vadd.f32 %v2054_v1, %v1127_v61  ;;  %v1621_v31 = vpop.permute.xlu2 %1620  ;;  %v1382_v17 = vand.u32 2147483648, %v2728_v37  ;;  %v1380_v20 = vand.u32 2147483647, %v2728_v37 }
 0x927   :  { %v1132_v16 = vsel %vm1131_vm9, %v2054_v1, %v1128_v21  ;;  %v1383_v27 = vor.u32 1.1754944e-38, %v1382_v17 }
 0x928   :  { %v1137_v18 = vsel %vm1134_vm11, %v1136_v14, %v1132_v16 }
 0x929   :  { %v1138_v23 = vmul.f32 %v2682_v19, %v1137_v18 }
 0x92b   :  { %1939 = vmatmul.msk.f32.vlgmr.msrb.gmra.mxu0 %vm185_vm1, %v1138_v23 }
 0x92c   :  { %1485 = vmatpush.msrb.mxu0 %v1465_v22 }
 0x933   :  { %1945 = vmatmul.msk.f32.vlgmr.msra.gmra.mxu0 %vm185_vm1, %v1294_v30 }
 0x934   :  { %1641 = vmatpush.msra.mxu0 %v1621_v31 }
 0x94c   :  { %v1448_v34 = vpop.xlane.xlu0 %1447 }
 0x94d   :  { %2055 = vrcp.f32 %v1448_v34  ;;  %v1460_v40 = vand.u32 2147483648, %v1448_v34  ;;  %v1458_v4 = vand.u32 2147483647, %v1448_v34  ;;  %vm1454_vm2 = vweird.f32 %v1448_v34 }
 0x94e   :  { %2057 = vrcp.f32 %v1201_v32 }
 0x94f   :  { %2059 = vrcp.f32 %v2728_v37  ;;  %v1461_v44 = vor.u32 1.1754944e-38, %v1460_v40  ;;  %vm1459_vm4 = vcmp.eq.f32.partialorder %v1458_v4, 8.507059e+37 }
 0x953   :  { %v2056_v35 = vpop.eup %2055 }
 0x954   :  { %v1450_v19 = vmul.f32 %v2056_v35, %v1448_v34  ;;  %v2726_v36 = vpop.xlane.xlu0 %1525  ;;  %v2058_v38 = vpop.eup %2057  ;;  %vm1455_vm15 = vweird.f32 %v2056_v35 }
 0x955   :  { %v1203_v42 = vmul.f32 %v2058_v38, %v1201_v32  ;;  %vm1456_vm3 = vmor %vm1454_vm2, %vm1455_vm15  ;;  %v2060_v48 = vpop.eup %2059  ;;  %vm1208_vm5 = vweird.f32 %v2058_v38  ;;  %vm1376_vm2 = vweird.f32 %v2728_v37  ;;  %v1538_v32 = vand.u32 2147483648, %v2726_v36 }
 0x956   :  { %v1451_v39 = vsub.f32 1.0, %v1450_v19  ;;  %v1372_v7 = vmul.f32 %v2060_v48, %v2728_v37  ;;  %vm1209_vm9 = vmor %vm1207_vm8, %vm1208_vm5  ;;  %vm1377_vm15 = vweird.f32 %v2060_v48  ;;  %vm1532_vm8 = vweird.f32 %v2726_v36 }
 0x957   :  { %v1204_v46 = vsub.f32 1.0, %v1203_v42  ;;  %v1539_v19 = vor.u32 1.1754944e-38, %v1538_v32 }
 0x958   :  { %v1452_v15 = vmul.f32 %v2056_v35, %v1451_v39  ;;  %v1373_v57 = vsub.f32 1.0, %v1372_v7 }
 0x959   :  { %v1205_v51 = vmul.f32 %v2058_v38, %v1204_v46 }
 0x95a   :  { %v1453_v43 = vadd.f32 %v2056_v35, %v1452_v15  ;;  %v1374_v3 = vmul.f32 %v2060_v48, %v1373_v57 }
 0x95b   :  { %v1206_v54 = vadd.f32 %v2058_v38, %v1205_v51 }
 0x95c   :  { %v1457_v8 = vsel %vm1456_vm3, %v2056_v35, %v1453_v43  ;;  %v1604_v45 = vpop.xlane.xlu0 %1603  ;;  %v1375_v14 = vadd.f32 %v2060_v48, %v1374_v3  ;;  %vm1378_vm3 = vmor %vm1376_vm2, %vm1377_vm15  ;;  %v1664_v43 = vld [vmem:[#allocation8 + $0x18] sm:$0xff] }
 0x95d   :  { %v1462_v47 = vsel %vm1459_vm4, %v1461_v44, %v1457_v8  ;;  %2061 = vrcp.f32 %v1604_v45  ;;  %v1616_v63 = vand.u32 2147483648, %v1604_v45  ;;  %v1614_v1 = vand.u32 2147483647, %v1604_v45  ;;  %v1663_v44 = vld [vmem:[#allocation8 + $0x10] sm:$0xff]  ;;  %1687 = vmatpush.msrb.mxu2 %v1664_v43  ;;  %v1662_v8 = vld [vmem:[#allocation8 + $0x8] sm:$0xff] }
 0x95e   :  { %v1463_v49 = vmul.f32 %v2707_v50, %v1462_v47  ;;  %2063 = vrcp.f32 %v2726_v36  ;;  %v1387_v50 = vpop.permute.xlu1 %1386  ;;  %v1210_v2 = vsel %vm1209_vm9, %v2058_v38, %v1206_v54  ;;  %vm1610_vm11 = vweird.f32 %v1604_v45 }
 0x95f   :  { %v1617_v61 = vor.u32 1.1754944e-38, %v1616_v63  ;;  %v1215_v12 = vsel %vm1212_vm12, %v1214_v6, %v1210_v2  ;;  %vm1615_vm14 = vcmp.eq.f32.partialorder %v1614_v1, 8.507059e+37  ;;  %v1379_v24 = vsel %vm1378_vm3, %v2060_v48, %v1375_v14  ;;  %1688 = vmatpush.msrb.mxu2 %v1663_v44 }
 0x960   :  { %1951 = vmatmul.msk.f32.vlgmr.msrb.gmra.mxu0 %vm185_vm1, %v1463_v49  ;;  %v1216_v23 = vmul.f32 %v2686_v26, %v1215_v12  ;;  %vm1381_vm4 = vcmp.eq.f32.partialorder %v1380_v20, 8.507059e+37  ;;  %v1536_v26 = vand.u32 2147483647, %v2726_v36  ;;  %v1749_v20 = vld [vmem:[#allocation10 + $0x8] sm:$0xff] }
 0x961   :  { %1689 = vmatpush.msrb.mxu2 %v1662_v8 }
 0x963   :  { %v2062_v52 = vpop.eup %2061 }
 0x964   :  { %v1606_v33 = vmul.f32 %v2062_v52, %v1604_v45  ;;  %v2064_v58 = vpop.eup %2063  ;;  %vm1611_vm10 = vweird.f32 %v2062_v52  ;;  %v1661_v45 = vld [vmem:[#allocation8] sm:$0xff] }
 0x965   :  { %v1528_v5 = vmul.f32 %v2064_v58, %v2726_v36  ;;  %vm1612_vm13 = vmor %vm1610_vm11, %vm1611_vm10  ;;  %vm1533_vm5 = vweird.f32 %v2064_v58  ;;  %vm1537_vm10 = vcmp.eq.f32.partialorder %v1536_v26, 8.507059e+37  ;;  %1690 = vmatpush.msrb.mxu2 %v1661_v45  ;;  %v1792_v26 = vld [vmem:[%s2849_s14 + $0x28] sm:$0xff] }
 0x966   :  { %v1607_v60 = vsub.f32 1.0, %v1606_v33  ;;  %v1543_v30 = vpop.permute.xlu1 %1542  ;;  %vm1534_vm9 = vmor %vm1532_vm8, %vm1533_vm5 }
 0x967   :  { %v1529_v13 = vsub.f32 1.0, %v1528_v5 }
 0x968   :  { %v1608_v0 = vmul.f32 %v2062_v52, %v1607_v60  ;;  %v1992_v60 = vld [vmem:[%s2846_s11] ss:$0 sm:$0xff] }
 0x969   :  { %v1530_v25 = vmul.f32 %v2064_v58, %v1529_v13 }
 0x96a   :  { %v1609_v9 = vadd.f32 %v2062_v52, %v1608_v0 }
 0x96b   :  { %v1531_v31 = vadd.f32 %v2064_v58, %v1530_v25 }
 0x96c   :  { %v1613_v21 = vsel %vm1612_vm13, %v2062_v52, %v1609_v9 }
 0x96d   :  { %v1618_v16 = vsel %vm1615_vm14, %v1617_v61, %v1613_v21  ;;  %v1535_v35 = vsel %vm1534_vm9, %v2064_v58, %v1531_v31  ;;  %v1793_v31 = vld [vmem:[%s2849_s14 + $0x30] sm:$0xff]  ;;  %vm1799_vm14 = vcmask 523264  }
 0x96e   :  { %v1619_v18 = vmul.f32 %v2716_v55, %v1618_v16  ;;  %v1384_v55 = vsel %vm1381_vm4, %v1383_v27, %v1379_v24  ;;  %v1540_v37 = vsel %vm1537_vm10, %v1539_v19, %v1535_v35 }
 0x96f   :  { %v1218_v22 = vpop.permute.xlu0 %1217  ;;  %v1385_v34 = vmul.f32 %v2690_v29, %v1384_v55  ;;  %v1541_v38 = vmul.f32 %v2712_v53, %v1540_v37  ;;  %v1084_v29 = vpop.f32.mrf.mxu1  ;;  %v1794_v55 = vld [vmem:[%s2849_s14 + $0x38] sm:$0xff]  ;;  %v1791_v37 = vld [vmem:[%s2849_s14 + $0x20] sm:$0xff] }
 0x970   :  { %1238 = vmatpush.msrb.mxu1 %v1218_v22  ;;  %1957 = vmatmul.msk.f32.vlgmr.msra.gmra.mxu0 %vm185_vm1, %v1619_v18  ;;  %v1750_v18 = vld [vmem:[#allocation10 + $0x10] sm:$0xff]  ;;  %v1748_v22 = vld [vmem:[#allocation10] sm:$0xff] }
 0x971   :  { %1942 = vmatmul.msk.f32.vlgmr.msrb.gmra.mxu1 %vm185_vm1, %v1216_v23  ;;  %1814 = vmatpush.msra.mxu3 %v1794_v55 }
 0x972   :  { %1407 = vmatpush.msra.mxu1 %v1387_v50 }
 0x973   :  { %1815 = vmatpush.msra.mxu3 %v1793_v31 }
 0x974   :  { %1563 = vmatpush.msrb.mxu1 %v1543_v30 }
 0x975   :  { %1816 = vmatpush.msra.mxu3 %v1792_v26 }
 0x977   :  { %1817 = vmatpush.msra.mxu3 %v1791_v37 }
 0x979   :  { %1948 = vmatmul.msk.f32.vlgmr.msra.gmra.mxu1 %vm185_vm1, %v1385_v34 }
 0x981   :  { %1954 = vmatmul.msk.f32.vlgmr.msrb.gmra.mxu1 %vm185_vm1, %v1541_v38 }
 0x9a8   :  { %v1162_v39 = vpop.f32.mrf.mxu0 }
 0x9a9   :  { %1322 = vrot.lane.b32.xlu0 %v1162_v39, %s2228_s2 }
 0x9b0   :  { %v1318_v40 = vpop.f32.mrf.mxu0 }
 0x9b1   :  { %1330 = vrot.lane.b32.xlu2 %v1318_v40, %s2245_s24  ;;  %v1790_v40 = vld [vmem:[%s2849_s14 + $0x18] sm:$0xff] }
 0x9b2   :  { %1818 = vmatpush.msra.mxu3 %v1790_v40 }
 0x9dd   :  { %v1487_v36 = vpop.f32.mrf.mxu0 }
 0x9de   :  { %1647 = vrot.lane.b32.xlu0 %v1487_v36, %s2228_s2 }
 0x9ed   :  { %v1643_v15 = vpop.f32.mrf.mxu0 }
 0x9ee   :  { %1655 = vrot.lane.b32.xlu2 %v1643_v15, %s2245_s24  ;;  %v1240_v4 = vpop.f32.mrf.mxu1 }
 0x9ef   :  { %1326 = vrot.lane.b32.xlu1 %v1240_v4, %s2244_s29 }
 0x9f6   :  { %v1409_v42 = vpop.f32.mrf.mxu1 }
 0x9fe   :  { %v1565_v53 = vpop.f32.mrf.mxu1 }
 0x9ff   :  { %1651 = vrot.lane.b32.xlu1 %v1565_v53, %s2244_s29 }
 0xa0b   :  { %v1331_v49 = vpop.permute.xlu2 %1330 }
 0xa1b   :  { %v1323_v46 = vpop.permute.xlu0 %1322 }
 0xa1c   :  { %v1333_v47 = vsel %vm185_vm1, %v1084_v29, %v1323_v46 }
 0xa48   :  { %v1656_v57 = vpop.permute.xlu2 %1655 }
 0xa50   :  { %v1648_v52 = vpop.permute.xlu0 %1647 }
 0xa51   :  { %v1658_v33 = vsel %vm185_vm1, %v1409_v42, %v1648_v52  ;;  %v1788_v52 = vld [vmem:[%s2849_s14 + $0x8] sm:$0xff] }
 0xa61   :  { %v1327_v48 = vpop.permute.xlu1 %1326 }
 0xa62   :  { %v1334_v51 = vsel %vm507_vm6, %v1333_v47, %v1327_v48 }
 0xa63   :  { %v1335_v7 = vsel %vm509_vm7, %v1334_v51, %v1331_v49 }
 0xa64   :  { %1958 = vmatmul.msk.f32.vlgmr.msrb.gmra.mxu2 %vm152_vm0, %v1335_v7  ;;  %v1789_v7 = vld [vmem:[%s2849_s14 + $0x10] sm:$0xff] }
 0xa65   :  { %1819 = vmatpush.msra.mxu3 %v1789_v7 }
 0xa67   :  { %1820 = vmatpush.msra.mxu3 %v1788_v52 }
 0xa71   :  { %v1652_v54 = vpop.permute.xlu1 %1651 }
 0xa72   :  { %v1659_v58 = vsel %vm507_vm6, %v1658_v33, %v1652_v54  ;;  %v1787_v33 = vld [vmem:[%s2849_s14] sm:$0xff] }
 0xa73   :  { %v1660_v59 = vsel %vm509_vm7, %v1659_v58, %v1656_v57  ;;  %1821 = vmatpush.msra.mxu3 %v1787_v33  ;;  %v1993_v54 = vld [vmem:[%s2848_s13] ss:$0 sm:$0xff]  ;;  %s2247_s13 = smov [#allocation11]  }
 0xa74   :  { %1959 = vmatmul.msk.f32.gmra.mxu2 %vm152_vm0, %v1660_v59  ;;  %s1885_s14 = sshll.u32 %s2247_s13, 4  ;;  %s1886_s14 = int_to_ptr.vmem [resolvable:$true] %s1885_s14 }
 0xae7   :  { %v1692_v62 = vpop.f32.mrf.mxu2 }
 0xae8   :  { %v1693_v63 = vadd.f32 %v1992_v60, %v1692_v62 }
 0xaea   :  { %v1698_v50 = vadd.f32 %v1693_v63, %v2598_v11 }
 0xaec   :  { %v1700_v0 = vsel %vm152_vm0, %v1698_v50, 0.0 }
 0xaed   :  { %1701 = vadd.xlane.f32.xlu0 %v1700_v0 }
 0xaf7   :  { %v1695_v1 = vpop.f32.mrf.mxu2 }
 0xaf8   :  { %v1696_v2 = vadd.f32 %v1992_v60, %v1695_v1 }
 0xafa   :  { %v1699_v3 = vadd.f32 %v1696_v2, %v2619_v28  ;;  %v1751_v28 = vld [vmem:[#allocation10 + $0x18] sm:$0xff] }
 0xafb   :  { %1774 = vmatpush.msra.mxu1 %v1751_v28 }
 0xafc   :  { %v1703_v5 = vsel %vm152_vm0, %v1699_v3, 0.0 }
 0xafd   :  { %1704 = vadd.xlane.f32.xlu1 %v1703_v5  ;;  %1775 = vmatpush.msra.mxu1 %v1750_v18 }
 0xaff   :  { %1776 = vmatpush.msra.mxu1 %v1749_v20 }
 0xb01   :  { %1777 = vmatpush.msra.mxu1 %v1748_v22 }
 0xb60   :  { %v1702_v6 = vpop.xlane.xlu0 %1701 }
 0xb61   :  { %v1706_v9 = vmul.f32 %v1702_v6, %v2566_v41 }
 0xb63   :  { %v1708_v61 = vsub.f32 %v1698_v50, %v1706_v9  ;;  %v1994_v50 = vld [vmem:[%s2850_s15] ss:$0 sm:$0xff] }
 0xb65   :  { %v1710_v12 = vmul.f32 %v1708_v61, %v1708_v61 }
 0xb67   :  { %v1712_v21 = vsel %vm152_vm0, %v1710_v12, 0.0 }
 0xb68   :  { %1713 = vadd.xlane.f32.xlu2 %v1712_v21 }
 0xb70   :  { %v1705_v14 = vpop.xlane.xlu1 %1704 }
 0xb71   :  { %v1707_v11 = vmul.f32 %v1705_v14, %v2566_v41 }
 0xb73   :  { %v1709_v13 = vsub.f32 %v1699_v3, %v1707_v11 }
 0xb75   :  { %v1711_v16 = vmul.f32 %v1709_v13, %v1709_v13 }
 0xb77   :  { %v1715_v17 = vsel %vm152_vm0, %v1711_v16, 0.0 }
 0xb78   :  { %1716 = vadd.xlane.f32.xlu0 %v1715_v17 }
 0xbdb   :  { %v1714_v23 = vpop.xlane.xlu2 %1713 }
 0xbdc   :  { %v1718_v24 = vmul.f32 %v1714_v23, %v2566_v41 }
 0xbde   :  { %v1720_v25 = vadd.f32 1e-05, %v1718_v24 }
 0xbe0   :  { %2065 = vrsqrt.f32 %v1720_v25  ;;  %vm1728_vm6 = vweird.f32 %v1720_v25 }
 0xbe6   :  { %v2066_v27 = vpop.eup %2065 }
 0xbe7   :  { %v1723_v30 = vmul.f32 %v2066_v27, %v1720_v25  ;;  %vm1729_vm1 = vweird.f32 %v2066_v27 }
 0xbe8   :  { %vm1730_vm7 = vmor %vm1728_vm6, %vm1729_vm1 }
 0xbe9   :  { %v1724_v32 = vmul.f32 %v2066_v27, %v1723_v30 }
 0xbeb   :  { %v1725_v34 = vmul.f32 0.5, %v1724_v32  ;;  %v1717_v35 = vpop.xlane.xlu0 %1716 }
 0xbec   :  { %v1719_v19 = vmul.f32 %v1717_v35, %v2566_v41 }
 0xbed   :  { %v1726_v38 = vsub.f32 1.5, %v1725_v34 }
 0xbee   :  { %v1721_v39 = vadd.f32 1e-05, %v1719_v19 }
 0xbef   :  { %v1727_v36 = vmul.f32 %v2066_v27, %v1726_v38 }
 0xbf0   :  { %2067 = vrsqrt.f32 %v1721_v39  ;;  %vm1738_vm12 = vweird.f32 %v1721_v39 }
 0xbf1   :  { %v1731_v29 = vsel %vm1730_vm7, %v2066_v27, %v1727_v36 }
 0xbf2   :  { %v1742_v15 = vmul.f32 %v1731_v29, %v1708_v61 }
 0xbf4   :  { %v1744_v4 = vmul.f32 %v2589_v56, %v1742_v15 }
 0xbf6   :  { %v2068_v42 = vpop.eup %2067  ;;  %v1746_v53 = vadd.f32 %v2594_v10, %v1744_v4 }
 0xbf7   :  { %v1733_v43 = vmul.f32 %v2068_v42, %v1721_v39  ;;  %vm1739_vm11 = vweird.f32 %v2068_v42 }
 0xbf8   :  { %1960 = vmatmul.msk.f32.vlgmr.msra.gmra.mxu1 %vm152_vm0, %v1746_v53  ;;  %vm1740_vm13 = vmor %vm1738_vm12, %vm1739_vm11 }
 0xbf9   :  { %v1734_v44 = vmul.f32 %v2068_v42, %v1733_v43 }
 0xbfb   :  { %v1735_v8 = vmul.f32 0.5, %v1734_v44 }
 0xbfd   :  { %v1736_v45 = vsub.f32 1.5, %v1735_v8 }
 0xbff   :  { %v1737_v46 = vmul.f32 %v2068_v42, %v1736_v45 }
 0xc01   :  { %v1741_v47 = vsel %vm1740_vm13, %v2068_v42, %v1737_v46 }
 0xc02   :  { %v1743_v48 = vmul.f32 %v1741_v47, %v1709_v13 }
 0xc04   :  { %v1745_v49 = vmul.f32 %v2589_v56, %v1743_v48 }
 0xc06   :  { %v1747_v51 = vadd.f32 %v2594_v10, %v1745_v49 }
 0xc08   :  { %1961 = vmatmul.msk.f32.gmra.mxu1 %vm152_vm0, %v1747_v51 }
 0xc75   :  { %v1779_v57 = vpop.f32.mrf.mxu1 }
 0xc76   :  { %v1780_v58 = vadd.f32 %v1993_v54, %v1779_v57 }
 0xc78   :  { %v1785_v59 = vmax.f32 %v1780_v58, 0.0 }
 0xc7a   :  { %1962 = vmatmul.msk.f32.vlgmr.msra.gmra.mxu3 %vm1799_vm14, %v1785_v59 }
 0xc85   :  { %v1782_v60 = vpop.f32.mrf.mxu1 }
 0xc86   :  { %v1783_v62 = vadd.f32 %v1993_v54, %v1782_v60 }
 0xc88   :  { %v1786_v63 = vmax.f32 %v1783_v62, 0.0 }
 0xc8a   :  { %1963 = vmatmul.msk.f32.gmra.mxu3 %vm1799_vm14, %v1786_v63 }
 0xcfd   :  { %v1823_v0 = vpop.f32.mrf.mxu3 }
 0xcfe   :  { %v1824_v1 = vadd.f32 %v1994_v50, %v1823_v0 }
 0xd00   :  { %v1829_v2 = vadd.f32 %v1824_v1, %v1746_v53 }
 0xd02   :  { %v1831_v3 = vsel %vm152_vm0, %v1829_v2, 0.0 }
 0xd03   :  { %1832 = vadd.xlane.f32.xlu2 %v1831_v3 }
 0xd0d   :  { %v1826_v5 = vpop.f32.mrf.mxu3 }
 0xd0e   :  { %v1827_v6 = vadd.f32 %v1994_v50, %v1826_v5 }
 0xd10   :  { %v1830_v9 = vadd.f32 %v1827_v6, %v1747_v51 }
 0xd12   :  { %v1834_v61 = vsel %vm152_vm0, %v1830_v9, 0.0 }
 0xd13   :  { %1835 = vadd.xlane.f32.xlu1 %v1834_v61 }
 0xd76   :  { %v1833_v12 = vpop.xlane.xlu2 %1832 }
 0xd77   :  { %v1837_v21 = vmul.f32 %v1833_v12, %v2566_v41 }
 0xd79   :  { %v1839_v14 = vsub.f32 %v1829_v2, %v1837_v21 }
 0xd7b   :  { %v1841_v11 = vmul.f32 %v1839_v14, %v1839_v14 }
 0xd7d   :  { %v1843_v13 = vsel %vm152_vm0, %v1841_v11, 0.0 }
 0xd7e   :  { %1844 = vadd.xlane.f32.xlu0 %v1843_v13 }
 0xd86   :  { %v1836_v16 = vpop.xlane.xlu1 %1835 }
 0xd87   :  { %v1838_v17 = vmul.f32 %v1836_v16, %v2566_v41 }
 0xd89   :  { %v1840_v28 = vsub.f32 %v1830_v9, %v1838_v17 }
 0xd8b   :  { %v1842_v18 = vmul.f32 %v1840_v28, %v1840_v28 }
 0xd8d   :  { %v1846_v20 = vsel %vm152_vm0, %v1842_v18, 0.0 }
 0xd8e   :  { %1847 = vadd.xlane.f32.xlu2 %v1846_v20 }
 0xdf1   :  { %v1845_v22 = vpop.xlane.xlu0 %1844 }
 0xdf2   :  { %v1849_v23 = vmul.f32 %v1845_v22, %v2566_v41 }
 0xdf4   :  { %v1851_v24 = vadd.f32 1e-05, %v1849_v23 }
 0xdf6   :  { %2069 = vrsqrt.f32 %v1851_v24  ;;  %vm1859_vm2 = vweird.f32 %v1851_v24 }
 0xdfc   :  { %v2070_v25 = vpop.eup %2069 }
 0xdfd   :  { %v1854_v27 = vmul.f32 %v2070_v25, %v1851_v24  ;;  %vm1860_vm15 = vweird.f32 %v2070_v25 }
 0xdfe   :  { %vm1861_vm3 = vmor %vm1859_vm2, %vm1860_vm15 }
 0xdff   :  { %v1855_v30 = vmul.f32 %v2070_v25, %v1854_v27 }
 0xe01   :  { %v1856_v55 = vmul.f32 0.5, %v1855_v30  ;;  %v1848_v31 = vpop.xlane.xlu2 %1847 }
 0xe02   :  { %v1850_v32 = vmul.f32 %v1848_v31, %v2566_v41 }
 0xe03   :  { %v1857_v26 = vsub.f32 1.5, %v1856_v55 }
 0xe04   :  { %v1852_v34 = vadd.f32 1e-05, %v1850_v32 }
 0xe05   :  { %v1858_v35 = vmul.f32 %v2070_v25, %v1857_v26 }
 0xe06   :  { %2071 = vrsqrt.f32 %v1852_v34  ;;  %vm1869_vm5 = vweird.f32 %v1852_v34 }
 0xe07   :  { %v1862_v19 = vsel %vm1861_vm3, %v2070_v25, %v1858_v35 }
 0xe08   :  { %v1873_v37 = vmul.f32 %v1862_v19, %v1839_v14 }
 0xe0a   :  { %v1875_v38 = vmul.f32 %v2589_v56, %v1873_v37  ;;  %v2073_v56 = vld [vmem:[%s2851_s16] ss:$0 sm:$0xff] }
 0xe0c   :  { %v2072_v39 = vpop.eup %2071  ;;  %v1877_v40 = vadd.f32 %v2594_v10, %v1875_v38 }
 0xe0d   :  { %v1864_v36 = vmul.f32 %v2072_v39, %v1852_v34  ;;  %vm1870_vm4 = vweird.f32 %v2072_v39 }
 0xe0e   :  { %1879 = vst.msk [vmem:[#allocation11] sm:$0xff] %vm152_vm0, %v1877_v40  ;;  %vm1871_vm8 = vmor %vm1869_vm5, %vm1870_vm4 }
 0xe0f   :  { %v1865_v29 = vmul.f32 %v2072_v39, %v1864_v36 }
 0xe11   :  { %v1866_v15 = vmul.f32 0.5, %v1865_v29 }
 0xe13   :  { %v1867_v41 = vsub.f32 1.5, %v1866_v15 }
 0xe15   :  { %v1868_v4 = vmul.f32 %v2072_v39, %v1867_v41 }
 0xe17   :  { %v1872_v42 = vsel %vm1871_vm8, %v2072_v39, %v1868_v4 }
 0xe18   :  { %v1874_v53 = vmul.f32 %v1872_v42, %v1840_v28 }
 0xe1a   :  { %v1876_v43 = vmul.f32 %v2073_v56, %v1874_v53 }
 0xe1c   :  { %v1878_v44 = vadd.f32 %v2594_v10, %v1876_v43 }
 0xe1e   :  { %1880 = vst.msk [vmem:[#allocation11 + $0x8] sm:$0xff] %vm152_vm0, %v1878_v44 }
 0xe1f   :  { %1893 = dma.vmem_to_hbm [thread:$0]  %s1886_s14, 256, %s1888_s17, [#allocation4], %s2227_s22, %s2227_s22, %s2228_s2  }
 0xe20   :  { %2224 = dma.done.wait [#allocation4], 256  }
 0xe21   :  { %2225 = vsyncadd [#allocation4], 4294967040 }
 0xe22   :  { %1898 = vsyncpa [#allocation3], 1 }
 0xe23   :  { %1899 = vsyncpa [#allocation6], 1 }
 0xe24   :  { %1900 = vsyncpa [#allocation9], 1 }
 0xe25   :  { %1901 = vsyncpa [#allocation4], 1 }

</bundles_post_ra>
